<compile_context>
chip_gen: v5e
topology: v5e:2x2
jax: 0.10.0
libtpu: 0.0.40
codegen_flags: <defaults>
</compile_context>

<pallas_src>
import functools

import jax
import jax.numpy as jnp
from jax.experimental import pallas as pl
from jax.experimental.pallas import tpu as pltpu


def _round_up(x, m):
    return (x + m - 1) // m * m


# ----------------------------------------------------------------------------
# Fused kernel: 3x3 conv (stride 1, pad 1) + InstanceNorm + LeakyReLU(0.2)
# ----------------------------------------------------------------------------
def _conv3x3_in_lrelu_kernel(xp_ref, w_ref, o_ref, acc_ref, *, H, W,
                             neg_slope, eps):
    # xp_ref : (1, H+2, W+2, Cin_p)  bf16  (halo-padded NHWC image)
    # w_ref  : (9, Cin_p, Cout_p)    bf16  (tap-major conv weights)
    # o_ref  : (1, H, W, Cout_p)     f32
    # acc_ref: (H*W, Cout_p)         f32   VMEM scratch accumulator
    xp = xp_ref[...]
    cin = xp.shape[-1]

    # 9-tap accumulation on the MXU (no im2col HBM blow-up).
    for t in range(9):
        dy, dx = divmod(t, 3)
        patch = xp[0, dy:dy + H, dx:dx + W, :].reshape(H * W, cin)
        contrib = jnp.dot(patch, w_ref[t], preferred_element_type=jnp.float32)
        if t == 0:
            acc_ref[...] = contrib
        else:
            acc_ref[...] += contrib

    # InstanceNorm2d (affine=False, biased variance) + LeakyReLU epilogue.
    acc = acc_ref[...]                                  # (H*W, Cout_p) f32
    mean = jnp.mean(acc, axis=0, keepdims=True)
    centered = acc - mean
    var = jnp.mean(centered * centered, axis=0, keepdims=True)
    y = centered * jax.lax.rsqrt(var + eps)
    y = jnp.where(y >= 0, y, neg_slope * y)
    o_ref[...] = y.reshape(1, H, W, acc.shape[-1]).astype(o_ref.dtype)


@jax.jit
def standard_conv_block(x_nchw, weight_oihw):
    """StandardConvBlock forward.

    x_nchw      : (N, Cin, H, W)  float32
    weight_oihw : (Cout, Cin, 3, 3) float32  (PyTorch Conv2d layout, no bias)
    returns     : (N, Cout, H, W) float32
    """
    N, Cin, H, W = x_nchw.shape
    Cout = weight_oihw.shape[0]
    # Only the module defaults are implemented: k=3, stride=1, padding=1.
    # TODO(synk): spatial tiling + two-pass InstanceNorm is needed if
    # (H+2)*(W+2)*Cin_p exceeds the VMEM budget (relevant on v7x, 64 MiB).

    Cin_p = _round_up(Cin, 128)
    Cout_p = _round_up(Cout, 128)

    # NCHW -> NHWC, 1-px spatial halo, lane padding, bf16 for the MXU.
    x = jnp.transpose(x_nchw, (0, 2, 3, 1))
    xp = jnp.pad(x, ((0, 0), (1, 1), (1, 1), (0, Cin_p - Cin)))
    xp = xp.astype(jnp.bfloat16)

    # (Cout, Cin, kh, kw) -> (kh, kw, Cin, Cout) -> (9, Cin_p, Cout_p)
    w = jnp.transpose(weight_oihw, (2, 3, 1, 0))
    w = jnp.pad(w, ((0, 0), (0, 0), (0, Cin_p - Cin), (0, Cout_p - Cout)))
    w = w.reshape(9, Cin_p, Cout_p).astype(jnp.bfloat16)

    kernel = functools.partial(_conv3x3_in_lrelu_kernel,
                               H=H, W=W, neg_slope=0.2, eps=1e-5)

    out = pl.pallas_call(
        kernel,
        out_shape=jax.ShapeDtypeStruct((N, H, W, Cout_p), jnp.float32),
        grid=(N,),
        in_specs=[
            pl.BlockSpec((1, H + 2, W + 2, Cin_p), lambda n: (n, 0, 0, 0)),
            pl.BlockSpec((9, Cin_p, Cout_p), lambda n: (0, 0, 0)),
        ],
        out_specs=pl.BlockSpec((1, H, W, Cout_p), lambda n: (n, 0, 0, 0)),
        scratch_shapes=[pltpu.VMEM((H * W, Cout_p), jnp.float32)],
        compiler_params=pltpu.CompilerParams(
            dimension_semantics=("parallel",),        # one image per TC on v7x
            vmem_limit_bytes=32 * 1024 * 1024,
        ),
    )(xp, w)

    out = out[..., :Cout]                              # drop lane padding
    return jnp.transpose(out, (0, 3, 1, 2))            # NHWC -> NCHW


# ----------------------------------------------------------------------------
# Pure-JAX reference (same bf16 operand cast, f32 accumulation)
# ----------------------------------------------------------------------------
def reference_standard_conv_block(x_nchw, weight_oihw, neg_slope=0.2, eps=1e-5):
    y = jax.lax.conv_general_dilated(
        x_nchw.astype(jnp.bfloat16), weight_oihw.astype(jnp.bfloat16),
        window_strides=(1, 1), padding=((1, 1), (1, 1)),
        dimension_numbers=("NCHW", "OIHW", "NCHW"),
        preferred_element_type=jnp.float32)
    mean = jnp.mean(y, axis=(2, 3), keepdims=True)
    var = jnp.mean((y - mean) ** 2, axis=(2, 3), keepdims=True)
    y = (y - mean) * jax.lax.rsqrt(var + eps)
    return jnp.where(y >= 0, y, neg_slope * y)


# ----------------------------------------------------------------------------
if __name__ == "__main__":
    key = jax.random.PRNGKey(0)
    k1, k2, k3, k4 = jax.random.split(key, 4)

    # Config 1: small channels (exercises the lane-padding path).
    x1 = jax.random.normal(k1, (2, 4, 16, 16), jnp.float32)
    w1 = 0.02 * jax.random.normal(k2, (8, 4, 3, 3), jnp.float32)  # setup_weights N(0,0.02)
    out1 = jax.block_until_ready(standard_conv_block(x1, w1))
    ref1 = reference_standard_conv_block(x1, w1)
    assert out1.shape == (2, 8, 16, 16)
    assert bool(jnp.all(jnp.isfinite(out1)))
    assert bool(jnp.allclose(out1, ref1, atol=2e-2, rtol=2e-2))

    # Config 2: MXU-friendly channel counts (64 -> 128).
    x2 = jax.random.normal(k3, (2, 64, 16, 16), jnp.float32)
    w2 = 0.02 * jax.random.normal(k4, (128, 64, 3, 3), jnp.float32)
    out2 = jax.block_until_ready(standard_conv_block(x2, w2))
    ref2 = reference_standard_conv_block(x2, w2)
    assert out2.shape == (2, 128, 16, 16)
    assert bool(jnp.all(jnp.isfinite(out2)))
    assert bool(jnp.allclose(out2, ref2, atol=2e-2, rtol=2e-2))

    print("KERNEL_OK")
</pallas_src>

<mosaic_0001>
module attributes {stable_mosaic.version = 11 : i64} {
  func.func @_conv3x3_in_lrelu_kernel(%arg0: i32, %arg1: memref<1x18x18x128xbf16, #tpu.memory_space<vmem>>, %arg2: memref<9x128x128xbf16, #tpu.memory_space<vmem>>, %arg3: memref<1x16x16x128xf32, #tpu.memory_space<vmem>>, %arg4: memref<256x128xf32, #tpu.memory_space<vmem>>) attributes {dimension_semantics = [#tpu.dimension_semantics<parallel>], iteration_bounds = array<i64: 2>, scalar_prefetch = 0 : i64, scratch_operands = 1 : i64, tpu.core_type = #tpu.core_type<tc>, window_params = [{transform_indices = @transform_0, window_bounds = array<i64: 1, 18, 18, 128>}, {pipeline_mode = #tpu.pipeline_mode<synchronous>, transform_indices = @transform_1, window_bounds = array<i64: 9, 128, 128>}, {transform_indices = @transform_2, window_bounds = array<i64: 1, 16, 16, 128>}]} {
    %c0 = arith.constant 0 : index
    %c0_0 = arith.constant 0 : index
    %c0_1 = arith.constant 0 : index
    %c0_2 = arith.constant 0 : index
    %0 = vector.load %arg1[%c0, %c0_0, %c0_1, %c0_2] : memref<1x18x18x128xbf16, #tpu.memory_space<vmem>>, vector<1x18x18x128xbf16>
    %1 = vector.extract_strided_slice %0 {offsets = [0, 0, 0, 0], sizes = [1, 16, 16, 128], strides = [1, 1, 1, 1]} : vector<1x18x18x128xbf16> to vector<1x16x16x128xbf16>
    %2 = vector.shape_cast %1 : vector<1x16x16x128xbf16> to vector<16x16x128xbf16>
    %3 = vector.shape_cast %2 : vector<16x16x128xbf16> to vector<256x128xbf16>
    %c0_3 = arith.constant 0 : index
    %c0_4 = arith.constant 0 : index
    %c0_5 = arith.constant 0 : index
    %4 = vector.load %arg2[%c0_3, %c0_4, %c0_5] : memref<9x128x128xbf16, #tpu.memory_space<vmem>>, vector<1x128x128xbf16>
    %5 = vector.shape_cast %4 : vector<1x128x128xbf16> to vector<128x128xbf16>
    %cst = arith.constant dense<0.000000e+00> : vector<256x128xf32>
    %6 = tpu.matmul %3, %5, %cst {dimension_numbers = #tpu.dot_dimension_numbers<[1], [0], [0], [1], [0, 0, 1, 1], [], []>} : vector<256x128xbf16>, vector<128x128xbf16>, vector<256x128xf32> -> vector<256x128xf32>
    %c0_6 = arith.constant 0 : index
    %c0_7 = arith.constant 0 : index
    %7 = vector.load %arg4[%c0_6, %c0_7] : memref<256x128xf32, #tpu.memory_space<vmem>>, vector<256x128xf32>
    tpu.vector_store %arg4[%c0_6, %c0_7], %6 {strides = array<i32>} : memref<256x128xf32, #tpu.memory_space<vmem>>, vector<256x128xf32>,
    %8 = vector.extract_strided_slice %0 {offsets = [0, 0, 1, 0], sizes = [1, 16, 16, 128], strides = [1, 1, 1, 1]} : vector<1x18x18x128xbf16> to vector<1x16x16x128xbf16>
    %9 = vector.shape_cast %8 : vector<1x16x16x128xbf16> to vector<16x16x128xbf16>
    %10 = vector.shape_cast %9 : vector<16x16x128xbf16> to vector<256x128xbf16>
    %c1 = arith.constant 1 : index
    %c0_8 = arith.constant 0 : index
    %c0_9 = arith.constant 0 : index
    %11 = vector.load %arg2[%c1, %c0_8, %c0_9] : memref<9x128x128xbf16, #tpu.memory_space<vmem>>, vector<1x128x128xbf16>
    %12 = vector.shape_cast %11 : vector<1x128x128xbf16> to vector<128x128xbf16>
    %cst_10 = arith.constant dense<0.000000e+00> : vector<256x128xf32>
    %13 = tpu.matmul %10, %12, %cst_10 {dimension_numbers = #tpu.dot_dimension_numbers<[1], [0], [0], [1], [0, 0, 1, 1], [], []>} : vector<256x128xbf16>, vector<128x128xbf16>, vector<256x128xf32> -> vector<256x128xf32>
    %c0_11 = arith.constant 0 : index
    %c0_12 = arith.constant 0 : index
    %14 = vector.load %arg4[%c0_11, %c0_12] : memref<256x128xf32, #tpu.memory_space<vmem>>, vector<256x128xf32>
    %15 = arith.addf %14, %13 : vector<256x128xf32>
    %c0_13 = arith.constant 0 : index
    %c0_14 = arith.constant 0 : index
    %16 = vector.load %arg4[%c0_13, %c0_14] : memref<256x128xf32, #tpu.memory_space<vmem>>, vector<256x128xf32>
    tpu.vector_store %arg4[%c0_13, %c0_14], %15 {strides = array<i32>} : memref<256x128xf32, #tpu.memory_space<vmem>>, vector<256x128xf32>,
    %17 = vector.extract_strided_slice %0 {offsets = [0, 0, 2, 0], sizes = [1, 16, 16, 128], strides = [1, 1, 1, 1]} : vector<1x18x18x128xbf16> to vector<1x16x16x128xbf16>
    %18 = vector.shape_cast %17 : vector<1x16x16x128xbf16> to vector<16x16x128xbf16>
    %19 = vector.shape_cast %18 : vector<16x16x128xbf16> to vector<256x128xbf16>
    %c2 = arith.constant 2 : index
    %c0_15 = arith.constant 0 : index
    %c0_16 = arith.constant 0 : index
    %20 = vector.load %arg2[%c2, %c0_15, %c0_16] : memref<9x128x128xbf16, #tpu.memory_space<vmem>>, vector<1x128x128xbf16>
    %21 = vector.shape_cast %20 : vector<1x128x128xbf16> to vector<128x128xbf16>
    %cst_17 = arith.constant dense<0.000000e+00> : vector<256x128xf32>
    %22 = tpu.matmul %19, %21, %cst_17 {dimension_numbers = #tpu.dot_dimension_numbers<[1], [0], [0], [1], [0, 0, 1, 1], [], []>} : vector<256x128xbf16>, vector<128x128xbf16>, vector<256x128xf32> -> vector<256x128xf32>
    %c0_18 = arith.constant 0 : index
    %c0_19 = arith.constant 0 : index
    %23 = vector.load %arg4[%c0_18, %c0_19] : memref<256x128xf32, #tpu.memory_space<vmem>>, vector<256x128xf32>
    %24 = arith.addf %23, %22 : vector<256x128xf32>
    %c0_20 = arith.constant 0 : index
    %c0_21 = arith.constant 0 : index
    %25 = vector.load %arg4[%c0_20, %c0_21] : memref<256x128xf32, #tpu.memory_space<vmem>>, vector<256x128xf32>
    tpu.vector_store %arg4[%c0_20, %c0_21], %24 {strides = array<i32>} : memref<256x128xf32, #tpu.memory_space<vmem>>, vector<256x128xf32>,
    %26 = vector.extract_strided_slice %0 {offsets = [0, 1, 0, 0], sizes = [1, 16, 16, 128], strides = [1, 1, 1, 1]} : vector<1x18x18x128xbf16> to vector<1x16x16x128xbf16>
    %27 = vector.shape_cast %26 : vector<1x16x16x128xbf16> to vector<16x16x128xbf16>
    %28 = vector.shape_cast %27 : vector<16x16x128xbf16> to vector<256x128xbf16>
    %c3 = arith.constant 3 : index
    %c0_22 = arith.constant 0 : index
    %c0_23 = arith.constant 0 : index
    %29 = vector.load %arg2[%c3, %c0_22, %c0_23] : memref<9x128x128xbf16, #tpu.memory_space<vmem>>, vector<1x128x128xbf16>
    %30 = vector.shape_cast %29 : vector<1x128x128xbf16> to vector<128x128xbf16>
    %cst_24 = arith.constant dense<0.000000e+00> : vector<256x128xf32>
    %31 = tpu.matmul %28, %30, %cst_24 {dimension_numbers = #tpu.dot_dimension_numbers<[1], [0], [0], [1], [0, 0, 1, 1], [], []>} : vector<256x128xbf16>, vector<128x128xbf16>, vector<256x128xf32> -> vector<256x128xf32>
    %c0_25 = arith.constant 0 : index
    %c0_26 = arith.constant 0 : index
    %32 = vector.load %arg4[%c0_25, %c0_26] : memref<256x128xf32, #tpu.memory_space<vmem>>, vector<256x128xf32>
    %33 = arith.addf %32, %31 : vector<256x128xf32>
    %c0_27 = arith.constant 0 : index
    %c0_28 = arith.constant 0 : index
    %34 = vector.load %arg4[%c0_27, %c0_28] : memref<256x128xf32, #tpu.memory_space<vmem>>, vector<256x128xf32>
    tpu.vector_store %arg4[%c0_27, %c0_28], %33 {strides = array<i32>} : memref<256x128xf32, #tpu.memory_space<vmem>>, vector<256x128xf32>,
    %35 = vector.extract_strided_slice %0 {offsets = [0, 1, 1, 0], sizes = [1, 16, 16, 128], strides = [1, 1, 1, 1]} : vector<1x18x18x128xbf16> to vector<1x16x16x128xbf16>
    %36 = vector.shape_cast %35 : vector<1x16x16x128xbf16> to vector<16x16x128xbf16>
    %37 = vector.shape_cast %36 : vector<16x16x128xbf16> to vector<256x128xbf16>
    %c4 = arith.constant 4 : index
    %c0_29 = arith.constant 0 : index
    %c0_30 = arith.constant 0 : index
    %38 = vector.load %arg2[%c4, %c0_29, %c0_30] : memref<9x128x128xbf16, #tpu.memory_space<vmem>>, vector<1x128x128xbf16>
    %39 = vector.shape_cast %38 : vector<1x128x128xbf16> to vector<128x128xbf16>
    %cst_31 = arith.constant dense<0.000000e+00> : vector<256x128xf32>
    %40 = tpu.matmul %37, %39, %cst_31 {dimension_numbers = #tpu.dot_dimension_numbers<[1], [0], [0], [1], [0, 0, 1, 1], [], []>} : vector<256x128xbf16>, vector<128x128xbf16>, vector<256x128xf32> -> vector<256x128xf32>
    %c0_32 = arith.constant 0 : index
    %c0_33 = arith.constant 0 : index
    %41 = vector.load %arg4[%c0_32, %c0_33] : memref<256x128xf32, #tpu.memory_space<vmem>>, vector<256x128xf32>
    %42 = arith.addf %41, %40 : vector<256x128xf32>
    %c0_34 = arith.constant 0 : index
    %c0_35 = arith.constant 0 : index
    %43 = vector.load %arg4[%c0_34, %c0_35] : memref<256x128xf32, #tpu.memory_space<vmem>>, vector<256x128xf32>
    tpu.vector_store %arg4[%c0_34, %c0_35], %42 {strides = array<i32>} : memref<256x128xf32, #tpu.memory_space<vmem>>, vector<256x128xf32>,
    %44 = vector.extract_strided_slice %0 {offsets = [0, 1, 2, 0], sizes = [1, 16, 16, 128], strides = [1, 1, 1, 1]} : vector<1x18x18x128xbf16> to vector<1x16x16x128xbf16>
    %45 = vector.shape_cast %44 : vector<1x16x16x128xbf16> to vector<16x16x128xbf16>
    %46 = vector.shape_cast %45 : vector<16x16x128xbf16> to vector<256x128xbf16>
    %c5 = arith.constant 5 : index
    %c0_36 = arith.constant 0 : index
    %c0_37 = arith.constant 0 : index
    %47 = vector.load %arg2[%c5, %c0_36, %c0_37] : memref<9x128x128xbf16, #tpu.memory_space<vmem>>, vector<1x128x128xbf16>
    %48 = vector.shape_cast %47 : vector<1x128x128xbf16> to vector<128x128xbf16>
    %cst_38 = arith.constant dense<0.000000e+00> : vector<256x128xf32>
    %49 = tpu.matmul %46, %48, %cst_38 {dimension_numbers = #tpu.dot_dimension_numbers<[1], [0], [0], [1], [0, 0, 1, 1], [], []>} : vector<256x128xbf16>, vector<128x128xbf16>, vector<256x128xf32> -> vector<256x128xf32>
    %c0_39 = arith.constant 0 : index
    %c0_40 = arith.constant 0 : index
    %50 = vector.load %arg4[%c0_39, %c0_40] : memref<256x128xf32, #tpu.memory_space<vmem>>, vector<256x128xf32>
    %51 = arith.addf %50, %49 : vector<256x128xf32>
    %c0_41 = arith.constant 0 : index
    %c0_42 = arith.constant 0 : index
    %52 = vector.load %arg4[%c0_41, %c0_42] : memref<256x128xf32, #tpu.memory_space<vmem>>, vector<256x128xf32>
    tpu.vector_store %arg4[%c0_41, %c0_42], %51 {strides = array<i32>} : memref<256x128xf32, #tpu.memory_space<vmem>>, vector<256x128xf32>,
    %53 = vector.extract_strided_slice %0 {offsets = [0, 2, 0, 0], sizes = [1, 16, 16, 128], strides = [1, 1, 1, 1]} : vector<1x18x18x128xbf16> to vector<1x16x16x128xbf16>
    %54 = vector.shape_cast %53 : vector<1x16x16x128xbf16> to vector<16x16x128xbf16>
    %55 = vector.shape_cast %54 : vector<16x16x128xbf16> to vector<256x128xbf16>
    %c6 = arith.constant 6 : index
    %c0_43 = arith.constant 0 : index
    %c0_44 = arith.constant 0 : index
    %56 = vector.load %arg2[%c6, %c0_43, %c0_44] : memref<9x128x128xbf16, #tpu.memory_space<vmem>>, vector<1x128x128xbf16>
    %57 = vector.shape_cast %56 : vector<1x128x128xbf16> to vector<128x128xbf16>
    %cst_45 = arith.constant dense<0.000000e+00> : vector<256x128xf32>
    %58 = tpu.matmul %55, %57, %cst_45 {dimension_numbers = #tpu.dot_dimension_numbers<[1], [0], [0], [1], [0, 0, 1, 1], [], []>} : vector<256x128xbf16>, vector<128x128xbf16>, vector<256x128xf32> -> vector<256x128xf32>
    %c0_46 = arith.constant 0 : index
    %c0_47 = arith.constant 0 : index
    %59 = vector.load %arg4[%c0_46, %c0_47] : memref<256x128xf32, #tpu.memory_space<vmem>>, vector<256x128xf32>
    %60 = arith.addf %59, %58 : vector<256x128xf32>
    %c0_48 = arith.constant 0 : index
    %c0_49 = arith.constant 0 : index
    %61 = vector.load %arg4[%c0_48, %c0_49] : memref<256x128xf32, #tpu.memory_space<vmem>>, vector<256x128xf32>
    tpu.vector_store %arg4[%c0_48, %c0_49], %60 {strides = array<i32>} : memref<256x128xf32, #tpu.memory_space<vmem>>, vector<256x128xf32>,
    %62 = vector.extract_strided_slice %0 {offsets = [0, 2, 1, 0], sizes = [1, 16, 16, 128], strides = [1, 1, 1, 1]} : vector<1x18x18x128xbf16> to vector<1x16x16x128xbf16>
    %63 = vector.shape_cast %62 : vector<1x16x16x128xbf16> to vector<16x16x128xbf16>
    %64 = vector.shape_cast %63 : vector<16x16x128xbf16> to vector<256x128xbf16>
    %c7 = arith.constant 7 : index
    %c0_50 = arith.constant 0 : index
    %c0_51 = arith.constant 0 : index
    %65 = vector.load %arg2[%c7, %c0_50, %c0_51] : memref<9x128x128xbf16, #tpu.memory_space<vmem>>, vector<1x128x128xbf16>
    %66 = vector.shape_cast %65 : vector<1x128x128xbf16> to vector<128x128xbf16>
    %cst_52 = arith.constant dense<0.000000e+00> : vector<256x128xf32>
    %67 = tpu.matmul %64, %66, %cst_52 {dimension_numbers = #tpu.dot_dimension_numbers<[1], [0], [0], [1], [0, 0, 1, 1], [], []>} : vector<256x128xbf16>, vector<128x128xbf16>, vector<256x128xf32> -> vector<256x128xf32>
    %c0_53 = arith.constant 0 : index
    %c0_54 = arith.constant 0 : index
    %68 = vector.load %arg4[%c0_53, %c0_54] : memref<256x128xf32, #tpu.memory_space<vmem>>, vector<256x128xf32>
    %69 = arith.addf %68, %67 : vector<256x128xf32>
    %c0_55 = arith.constant 0 : index
    %c0_56 = arith.constant 0 : index
    %70 = vector.load %arg4[%c0_55, %c0_56] : memref<256x128xf32, #tpu.memory_space<vmem>>, vector<256x128xf32>
    tpu.vector_store %arg4[%c0_55, %c0_56], %69 {strides = array<i32>} : memref<256x128xf32, #tpu.memory_space<vmem>>, vector<256x128xf32>,
    %71 = vector.extract_strided_slice %0 {offsets = [0, 2, 2, 0], sizes = [1, 16, 16, 128], strides = [1, 1, 1, 1]} : vector<1x18x18x128xbf16> to vector<1x16x16x128xbf16>
    %72 = vector.shape_cast %71 : vector<1x16x16x128xbf16> to vector<16x16x128xbf16>
    %73 = vector.shape_cast %72 : vector<16x16x128xbf16> to vector<256x128xbf16>
    %c8 = arith.constant 8 : index
    %c0_57 = arith.constant 0 : index
    %c0_58 = arith.constant 0 : index
    %74 = vector.load %arg2[%c8, %c0_57, %c0_58] : memref<9x128x128xbf16, #tpu.memory_space<vmem>>, vector<1x128x128xbf16>
    %75 = vector.shape_cast %74 : vector<1x128x128xbf16> to vector<128x128xbf16>
    %cst_59 = arith.constant dense<0.000000e+00> : vector<256x128xf32>
    %76 = tpu.matmul %73, %75, %cst_59 {dimension_numbers = #tpu.dot_dimension_numbers<[1], [0], [0], [1], [0, 0, 1, 1], [], []>} : vector<256x128xbf16>, vector<128x128xbf16>, vector<256x128xf32> -> vector<256x128xf32>
    %c0_60 = arith.constant 0 : index
    %c0_61 = arith.constant 0 : index
    %77 = vector.load %arg4[%c0_60, %c0_61] : memref<256x128xf32, #tpu.memory_space<vmem>>, vector<256x128xf32>
    %78 = arith.addf %77, %76 : vector<256x128xf32>
    %c0_62 = arith.constant 0 : index
    %c0_63 = arith.constant 0 : index
    %79 = vector.load %arg4[%c0_62, %c0_63] : memref<256x128xf32, #tpu.memory_space<vmem>>, vector<256x128xf32>
    tpu.vector_store %arg4[%c0_62, %c0_63], %78 {strides = array<i32>} : memref<256x128xf32, #tpu.memory_space<vmem>>, vector<256x128xf32>,
    %c0_64 = arith.constant 0 : index
    %c0_65 = arith.constant 0 : index
    %80 = vector.load %arg4[%c0_64, %c0_65] : memref<256x128xf32, #tpu.memory_space<vmem>>, vector<256x128xf32>
    %cst_66 = arith.constant dense<0.000000e+00> : vector<128xf32>
    %81 = vector.multi_reduction <add>, %80, %cst_66 [0] : vector<256x128xf32> to vector<128xf32>
    %82 = vector.shape_cast %81 : vector<128xf32> to vector<1x128xf32>
    %cst_67 = arith.constant 2.560000e+02 : f32
    %83 = vector.broadcast %cst_67 : f32 to vector<1x128xf32>
    %84 = arith.divf %82, %83 : vector<1x128xf32>
    %85 = vector.broadcast %84 : vector<1x128xf32> to vector<256x128xf32>
    %86 = arith.subf %80, %85 : vector<256x128xf32>
    %87 = arith.mulf %86, %86 : vector<256x128xf32>
    %cst_68 = arith.constant dense<0.000000e+00> : vector<128xf32>
    %88 = vector.multi_reduction <add>, %87, %cst_68 [0] : vector<256x128xf32> to vector<128xf32>
    %89 = vector.shape_cast %88 : vector<128xf32> to vector<1x128xf32>
    %cst_69 = arith.constant 2.560000e+02 : f32
    %90 = vector.broadcast %cst_69 : f32 to vector<1x128xf32>
    %91 = arith.divf %89, %90 : vector<1x128xf32>
    %cst_70 = arith.constant 9.99999974E-6 : f32
    %92 = vector.broadcast %cst_70 : f32 to vector<1x128xf32>
    %93 = arith.addf %91, %92 : vector<1x128xf32>
    %94 = math.rsqrt %93 : vector<1x128xf32>
    %95 = vector.broadcast %94 : vector<1x128xf32> to vector<256x128xf32>
    %96 = arith.mulf %86, %95 : vector<256x128xf32>
    %cst_71 = arith.constant 0.000000e+00 : f32
    %97 = vector.broadcast %cst_71 : f32 to vector<256x128xf32>
    %98 = arith.cmpf oge, %96, %97 : vector<256x128xf32>
    %cst_72 = arith.constant 2.000000e-01 : f32
    %99 = vector.broadcast %cst_72 : f32 to vector<256x128xf32>
    %100 = arith.mulf %99, %96 : vector<256x128xf32>
    %101 = arith.select %98, %96, %100 : vector<256x128xi1>, vector<256x128xf32>
    %102 = vector.shape_cast %101 : vector<256x128xf32> to vector<1x16x16x128xf32>
    %c0_73 = arith.constant 0 : index
    %c0_74 = arith.constant 0 : index
    %c0_75 = arith.constant 0 : index
    %c0_76 = arith.constant 0 : index
    %103 = vector.load %arg3[%c0_73, %c0_74, %c0_75, %c0_76] : memref<1x16x16x128xf32, #tpu.memory_space<vmem>>, vector<1x16x16x128xf32>
    tpu.vector_store %arg3[%c0_73, %c0_74, %c0_75, %c0_76], %102 {strides = array<i32>} : memref<1x16x16x128xf32, #tpu.memory_space<vmem>>, vector<1x16x16x128xf32>,
    return
  }
  func.func @transform_0(%arg0: i32) -> (i32, i32, i32, i32) {
    %c0_i32 = arith.constant 0 : i32
    %c0_i32_0 = arith.constant 0 : i32
    %c0_i32_1 = arith.constant 0 : i32
    %c0_i32_2 = arith.constant 0 : i32
    return %arg0, %c0_i32, %c0_i32_0, %c0_i32_1 : i32, i32, i32, i32
  }
  func.func @transform_1(%arg0: i32) -> (i32, i32, i32) {
    %c0_i32 = arith.constant 0 : i32
    %c0_i32_0 = arith.constant 0 : i32
    %c0_i32_1 = arith.constant 0 : i32
    %c0_i32_2 = arith.constant 0 : i32
    return %c0_i32, %c0_i32_0, %c0_i32_1 : i32, i32, i32
  }
  func.func @transform_2(%arg0: i32) -> (i32, i32, i32, i32) {
    %c0_i32 = arith.constant 0 : i32
    %c0_i32_0 = arith.constant 0 : i32
    %c0_i32_1 = arith.constant 0 : i32
    %c0_i32_2 = arith.constant 0 : i32
    return %arg0, %c0_i32, %c0_i32_0, %c0_i32_1 : i32, i32, i32, i32
  }
}

</mosaic_0001>

<bundles_post_ra>
// kernel: standard_conv_block.1
= control target key start
LH: loop header
LB: loop body
LE: loop exit
PB: predicated region body
PF: predicated region fallthrough
CT: control target
= control target key end

     0   :  { %s4305_s9 = smov 0   ;;  %s5809_s0 = inlined_call_operand.vmem [shape: bf16[2,18,18,128], index: 0, kind: input, shape index: {}]   ;;  %s5810_s1 = inlined_call_operand.vmem [shape: bf16[9,128,128], index: 1, kind: input, shape index: {}]   ;;  %s5811_s2 = inlined_call_operand.vmem [shape: f32[2,16,16,128], index: 2, kind: output, shape index: {}]  }
   0x1 LB: > { %s3622_s10 = sadd.s32 4294967295, %s4287_s9   ;;  %p3626_p0 = scmp.ge.s32.totalorder %s4287_s9, 1  ;;  %s4287_s9 = sphi %s4305_s9, %s12_s9  }
   0x2   : > { %p112_p1 = scmp.lt.s32.totalorder %s4287_s9, 3 }
   0x4   : > { %p113_p2 = pnand %p3626_p0, %p112_p1 }
   0x6   : > { %116 = sbr.rel (%p113_p2) target bundleno = 903 (0x387), region = 28 }
   0xb   : > { %v4164_v0 = vld [vmem:[%s5810_s1 + $0x38] sm:$0xff]  ;;  %v4163_v1 = vld [vmem:[%s5810_s1 + $0x30] sm:$0xff]  ;;  %v4162_v2 = vld [vmem:[%s5810_s1 + $0x28] sm:$0xff]  ;;  %p134_p3 = scmp.lt.s32.totalorder %s3622_s10, 1  ;;  %vm479_vm0 = vsmask.f32 3328 }
   0xc   : > { %4229 = vmatpush.bf16.msra.mxu1 %v4164_v0  ;;  %4230 = vmatpush.bf16.msra.mxu2 %v4164_v0  ;;  %v4161_v3 = vld [vmem:[%s5810_s1 + $0x20] sm:$0xff]  ;;  %v4160_v4 = vld [vmem:[%s5810_s1 + $0x18] sm:$0xff]  ;;  %v4159_v5 = vld [vmem:[%s5810_s1 + $0x10] sm:$0xff]  ;;  %vm480_vm1 = vsmask.f32 7440  ;;  %vm1196_vm2 = vcmask 1042432  }
   0xd   : > { %4231 = vmatpush.bf16.msra.mxu3 %v4164_v0  ;;  %358 = vmatpush.bf16.msra.mxu0 %v4164_v0  ;;  %s5905_s10 = smov (!%p134_p3, %s3622_s10), 1  ;;  %v4158_v6 = vld [vmem:[%s5810_s1 + $0x8] sm:$0xff]  ;;  %v4157_v7 = vld [vmem:[%s5810_s1] sm:$0xff]  ;;  %v4180_v8 = vld [vmem:[%s5810_s1 + $0xb8] sm:$0xff]  ;;  %vm1197_vm3 = vcmask 1046532  }
   0xe   : > { %s4253_s25 = smul.u32 216, %s5905_s10  ;;  %v4188_v9 = vld [vmem:[%s5810_s1 + $0xf8] sm:$0xff]  ;;  %v4179_v16 = vld [vmem:[%s5810_s1 + $0xb0] sm:$0xff]  ;;  %v4178_v20 = vld [vmem:[%s5810_s1 + $0xa8] sm:$0xff] }
   0xf   : > { %v4172_v14 = vld [vmem:[%s5810_s1 + $0x78] sm:$0xff]  ;;  %v4187_v17 = vld [vmem:[%s5810_s1 + $0xf0] sm:$0xff]  ;;  %v4186_v21 = vld [vmem:[%s5810_s1 + $0xe8] sm:$0xff] }
  0x10   : > { %4232 = vmatpush.bf16.msra.mxu1 %v4163_v1  ;;  %4233 = vmatpush.bf16.msra.mxu2 %v4163_v1  ;;  %s4347_s30 = scalar_lea.vmem %s5809_s0, %s4253_s25  ;;  %v4196_v15 = vld [vmem:[%s5810_s1 + $0x138] sm:$0xff]  ;;  %v4171_v18 = vld [vmem:[%s5810_s1 + $0x70] sm:$0xff]  ;;  %v4170_v22 = vld [vmem:[%s5810_s1 + $0x68] sm:$0xff] }
  0x11   : > { %4234 = vmatpush.bf16.msra.mxu3 %v4163_v1  ;;  %359 = vmatpush.bf16.msra.mxu0 %v4163_v1  ;;  %v4356_v10 = vld [vmem:[%s4347_s30 + $0x30] sm:$0xff]  ;;  %v4359_v11 = vld [vmem:[%s4347_s30 + $0x60] sm:$0xff]  ;;  %v4194_v23 = vld [vmem:[%s5810_s1 + $0x128] sm:$0xff] }
  0x12   : > { %v4151_v12 = vld [vmem:[%s4347_s30 + $0x90] sm:$0xff]  ;;  %v4139_v13 = vld [vmem:[%s4347_s30] sm:$0xff]  ;;  %v4176_v28 = vld [vmem:[%s5810_s1 + $0x98] sm:$0xff] }
  0x13   : > { %v4195_v19 = vld [vmem:[%s5810_s1 + $0x130] sm:$0xff]  ;;  %v4177_v24 = vld [vmem:[%s5810_s1 + $0xa0] sm:$0xff]  ;;  %v4184_v29 = vld [vmem:[%s5810_s1 + $0xd8] sm:$0xff] }
  0x14   : > { %4235 = vmatpush.bf16.msra.mxu1 %v4162_v2  ;;  %4236 = vmatpush.bf16.msra.mxu2 %v4162_v2  ;;  %v4185_v25 = vld [vmem:[%s5810_s1 + $0xe0] sm:$0xff]  ;;  %v4417_v31 = vld [vmem:[%s4347_s30 + $0x6c] sm:$0xff]  ;;  %v4168_v34 = vld [vmem:[%s5810_s1 + $0x58] sm:$0xff] }
  0x15   : > { %4237 = vmatpush.bf16.msra.mxu3 %v4162_v2  ;;  %360 = vmatpush.bf16.msra.mxu0 %v4162_v2  ;;  %v4169_v26 = vld [vmem:[%s5810_s1 + $0x60] sm:$0xff]  ;;  %v4421_v33 = vld [vmem:[%s4347_s30 + $0xc] sm:$0xff]  ;;  %v4192_v35 = vld [vmem:[%s5810_s1 + $0x118] sm:$0xff] }
  0x16   : > { %v4193_v27 = vld [vmem:[%s5810_s1 + $0x120] sm:$0xff]  ;;  %v4175_v36 = vld [vmem:[%s5810_s1 + $0x90] sm:$0xff]  ;;  %v4174_v40 = vld [vmem:[%s5810_s1 + $0x88] sm:$0xff] }
  0x17   : > { %v4414_v30 = vld [vmem:[%s4347_s30 + $0x3c] sm:$0xff]  ;;  %v4183_v37 = vld [vmem:[%s5810_s1 + $0xd0] sm:$0xff]  ;;  %v4182_v41 = vld [vmem:[%s5810_s1 + $0xc8] sm:$0xff] }
  0x18   : > { %4238 = vmatpush.bf16.msra.mxu1 %v4161_v3  ;;  %4239 = vmatpush.bf16.msra.mxu2 %v4161_v3  ;;  %v4152_v32 = vld [vmem:[%s4347_s30 + $0x9c] sm:$0xff]  ;;  %v4167_v38 = vld [vmem:[%s5810_s1 + $0x50] sm:$0xff]  ;;  %v4166_v42 = vld [vmem:[%s5810_s1 + $0x48] sm:$0xff] }
  0x19   : > { %4240 = vmatpush.bf16.msra.mxu3 %v4161_v3  ;;  %361 = vmatpush.bf16.msra.mxu0 %v4161_v3  ;;  %v4191_v39 = vld [vmem:[%s5810_s1 + $0x110] sm:$0xff]  ;;  %v4190_v43 = vld [vmem:[%s5810_s1 + $0x108] sm:$0xff]  ;;  %v4173_v44 = vld [vmem:[%s5810_s1 + $0x80] sm:$0xff] }
  0x1a   : > { %v4181_v45 = vld [vmem:[%s5810_s1 + $0xc0] sm:$0xff]  ;;  %v4469_v48 = vld [vmem:[%s4347_s30 + $0x48] sm:$0xff]  ;;  %v4149_v49 = vld [vmem:[%s4347_s30 + $0x78] sm:$0xff] }
  0x1b   : > { %v4165_v46 = vld [vmem:[%s5810_s1 + $0x40] sm:$0xff]  ;;  %v4153_v50 = vld [vmem:[%s4347_s30 + $0xa8] sm:$0xff]  ;;  %v4474_v51 = vld [vmem:[%s4347_s30 + $0x18] sm:$0xff] }
  0x1c   : > { %4241 = vmatpush.bf16.msra.mxu1 %v4160_v4  ;;  %4242 = vmatpush.bf16.msra.mxu2 %v4160_v4  ;;  %v4189_v47 = vld [vmem:[%s5810_s1 + $0x100] sm:$0xff]  ;;  %v4212_v54 = vld [vmem:[%s5810_s1 + $0x1b8] sm:$0xff]  ;;  %v4501_v62 = vld [vmem:[%s4347_s30 + $0xc] sm:$0xf] }
  0x1d   : > { %4243 = vmatpush.bf16.msra.mxu3 %v4160_v4  ;;  %362 = vmatpush.bf16.msra.mxu0 %v4160_v4  ;;  %v4477_v52 = vld [vmem:[%s4347_s30] sm:$0xf]  ;;  %v4481_v53 = vld [vmem:[%s4347_s30 + $0x4] sm:$0xf]  ;;  %v4220_v55 = vld [vmem:[%s5810_s1 + $0x1f8] sm:$0xff]  ;;  %v507_v1 = vshrl.u32 %v4501_v62, 16 }
  0x1e   : > { %v4204_v56 = vld [vmem:[%s5810_s1 + $0x178] sm:$0xff]  ;;  %v483_v57 = vshrl.u32 %v4477_v52, 16  ;;  %v486_v58 = vshll.u32 %v4477_v52, 16  ;;  %v492_v60 = vshll.u32 %v4481_v53, 16  ;;  %v496_v61 = vshrl.u32 %v4481_v53, 16  ;;  %vm4525_vm4 = vmor %vm479_vm0, %vm480_vm1 }
  0x1f   : > { %v4228_v59 = vld [vmem:[%s5810_s1 + $0x238] sm:$0xff]  ;;  %v4504_v63 = vld [vmem:[%s4347_s30 + $0x10] sm:$0xf]  ;;  %v146_v0 = vld [vmem:[%s4347_s30 + $0x8] sm:$0x1]  ;;  %v510_v2 = vshll.u32 %v4501_v62, 16 }
  0x20   : > { %4244 = vmatpush.bf16.msra.mxu1 %v4159_v5  ;;  %4245 = vmatpush.bf16.msra.mxu2 %v4159_v5  ;;  %v516_v3 = vshll.u32 %v4504_v63, 16  ;;  %v520_v4 = vshrl.u32 %v4504_v63, 16  ;;  %vm4530_vm5 = vmor %vm1196_vm2, %vm1197_vm3 }
  0x21   : > { %4246 = vmatpush.bf16.msra.mxu3 %v4159_v5  ;;  %363 = vmatpush.bf16.msra.mxu0 %v4159_v5  ;;  %v485_v5 = vrot.slane %v483_v57, 4 }
  0x24   : > { %4247 = vmatpush.bf16.msra.mxu1 %v4158_v6  ;;  %4248 = vmatpush.bf16.msra.mxu2 %v4158_v6 }
  0x25   : > { %4249 = vmatpush.bf16.msra.mxu3 %v4158_v6  ;;  %364 = vmatpush.bf16.msra.mxu0 %v4158_v6  ;;  %v488_v6 = vrot.slane %v486_v58, 5 }
  0x28   : > { %4250 = vmatpush.bf16.msra.mxu1 %v4157_v7  ;;  %4251 = vmatpush.bf16.msra.mxu2 %v4157_v7 }
  0x29   : > { %4252 = vmatpush.bf16.msra.mxu3 %v4157_v7  ;;  %365 = vmatpush.bf16.msra.mxu0 %v4157_v7  ;;  %v494_v7 = vrot.slane %v492_v60, 5 }
  0x2b   : > { %386 = vmatmul.bf16.vlgmr.msra.gmra.mxu1 %v4356_v10  ;;  %406 = vmatmul.bf16.vlgmr.msra.gmra.mxu2 %v4359_v11 }
  0x2c   : > { %1440 = vmatpush.bf16.msrb.mxu2 %v4180_v8  ;;  %426 = vmatmul.bf16.vlgmr.msra.gmra.mxu3 %v4151_v12  ;;  %v498_v8 = vrot.slane %v496_v61, 4  ;;  %v509_v12 = vrot.slane %v507_v1, 4 }
  0x2d   : > { %1696 = vmatpush.bf16.msrb.mxu3 %v4188_v9  ;;  %366 = vmatmul.bf16.vlgmr.msra.gmra.mxu0 %v4139_v13  ;;  %v502_v9 = vshll.u32 %v146_v0, 16  ;;  %v512_v13 = vrot.slane %v510_v2, 5 }
  0x2e   : > { %995 = vmatpush.bf16.msrb.mxu1 %v4172_v14  ;;  %1974 = vmatpush.bf16.msrb.mxu0 %v4196_v15  ;;  %v518_v14 = vrot.slane %v516_v3, 5  ;;  %v522_v15 = vrot.slane %v520_v4, 4  ;;  %v4558_v3 = vld [vmem:[%s4347_s30 + $0x20] sm:$0x1] }
  0x30   : > { %1441 = vmatpush.bf16.msrb.mxu2 %v4179_v16  ;;  %v489_v16 = vor.u32 %v488_v6, %v485_v5  ;;  %v1208_v5 = vrot.slane %v4504_v63, 5  ;;  %v4211_v63 = vld [vmem:[%s5810_s1 + $0x1b0] sm:$0xff] }
  0x31   : > { %1697 = vmatpush.bf16.msrb.mxu3 %v4187_v17  ;;  %v499_v17 = vor.u32 %v498_v8, %v494_v7 }
  0x32   : > { %996 = vmatpush.bf16.msrb.mxu1 %v4171_v18  ;;  %1975 = vmatpush.bf16.msrb.mxu0 %v4195_v19  ;;  %v1201_v18 = vrot.slane %v4481_v53, 5  ;;  %v4513_v19 = vld [vmem:[%s4347_s30 + $0x14] sm:$0x1] }
  0x34   : > { %1442 = vmatpush.bf16.msrb.mxu2 %v4178_v20  ;;  %v4516_v20 = vld [vmem:[%s4347_s30 + $0x54] sm:$0xff] }
  0x35   : > { %1698 = vmatpush.bf16.msrb.mxu3 %v4186_v21  ;;  %v4150_v21 = vld [vmem:[%s4347_s30 + $0x84] sm:$0xff] }
  0x36   : > { %997 = vmatpush.bf16.msrb.mxu1 %v4170_v22  ;;  %1976 = vmatpush.bf16.msrb.mxu0 %v4194_v23  ;;  %v4154_v22 = vld [vmem:[%s4347_s30 + $0xb4] sm:$0xff]  ;;  %v4521_v23 = vld [vmem:[%s4347_s30 + $0x24] sm:$0xff] }
  0x38   : > { %1443 = vmatpush.bf16.msrb.mxu2 %v4177_v24  ;;  %v504_v24 = vrot.slane %v502_v9, 5  ;;  %v550_v9 = vshll.u32 %v4558_v3, 16 }
  0x39   : > { %1699 = vmatpush.bf16.msrb.mxu3 %v4185_v25  ;;  %v3774_v25 = vrot.slane %v4477_v52, 9 }
  0x3a   : > { %998 = vmatpush.bf16.msrb.mxu1 %v4169_v26  ;;  %1977 = vmatpush.bf16.msrb.mxu0 %v4193_v27  ;;  %v513_v26 = vor.u32 %v512_v13, %v509_v12  ;;  %v523_v27 = vor.u32 %v522_v15, %v518_v14  ;;  %v3775_v13 = vrot.slane %v4501_v62, 9  ;;  %v1211_v15 = vrot.slane %v4513_v19, 5  ;;  %v4203_v62 = vld [vmem:[%s5810_s1 + $0x170] sm:$0xff] }
  0x3b   : > { %391 = vmatmul.bf16.gmra.mxu1 %v4414_v30  ;;  %411 = vmatmul.bf16.gmra.mxu2 %v4417_v31 }
  0x3c   : > { %1444 = vmatpush.bf16.msrb.mxu2 %v4176_v28  ;;  %431 = vmatmul.bf16.gmra.mxu3 %v4152_v32  ;;  %v526_v28 = vshll.u32 %v4513_v19, 16  ;;  %v490_v32 = vrot.slane %v489_v16, 4  ;;  %v4578_v19 = vld [vmem:[%s4347_s30 + $0x28] sm:$0xf] }
  0x3d   : > { %1700 = vmatpush.bf16.msrb.mxu3 %v4184_v29  ;;  %371 = vmatmul.bf16.gmra.mxu0 %v4421_v33 }
  0x3e   : > { %999 = vmatpush.bf16.msrb.mxu1 %v4168_v34  ;;  %1978 = vmatpush.bf16.msrb.mxu0 %v4192_v35  ;;  %v500_v34 = vrot.slane %v499_v17, 4  ;;  %v1203_v35 = vrot.slane %v1201_v18, 4 }
  0x40   : > { %1445 = vmatpush.bf16.msrb.mxu2 %v4175_v36  ;;  %v1204_v36 = vrot.slane %v146_v0, 5 }
  0x41   : > { %1701 = vmatpush.bf16.msrb.mxu3 %v4183_v37 }
  0x42   : > { %1000 = vmatpush.bf16.msrb.mxu1 %v4167_v38  ;;  %1979 = vmatpush.bf16.msrb.mxu0 %v4191_v39  ;;  %v4536_v38 = vld [vmem:[%s4347_s30 + $0x18] sm:$0xf]  ;;  %v4539_v39 = vld [vmem:[%s4347_s30 + $0x1c] sm:$0xf] }
  0x43   : > { %v544_v52 = vshrl.u32 %v4539_v39, 16 }
  0x44   : > { %1446 = vmatpush.bf16.msrb.mxu2 %v4174_v40  ;;  %v514_v40 = vrot.slane %v513_v26, 4 }
  0x45   : > { %1702 = vmatpush.bf16.msrb.mxu3 %v4182_v41  ;;  %v524_v41 = vrot.slane %v523_v27, 4  ;;  %v546_v0 = vrot.slane %v544_v52, 4 }
  0x46   : > { %1001 = vmatpush.bf16.msrb.mxu1 %v4166_v42  ;;  %1980 = vmatpush.bf16.msrb.mxu0 %v4190_v43  ;;  %v528_v42 = vrot.slane %v526_v28, 5  ;;  %v495_v43 = vsel %vm4525_vm4, %v490_v32, %v494_v7  ;;  %v519_v53 = vsel %vm4525_vm4, %v514_v40, %v518_v14  ;;  %v1210_v14 = vrot.slane %v1208_v5, 4 }
  0x47   : > { %v885_v1 = vunpack.c.l.b16 %v519_v53 }
  0x48   : > { %1447 = vmatpush.bf16.msrb.mxu2 %v4173_v44  ;;  %v505_v44 = vsel %vm4525_vm4, %v500_v34, %v504_v24  ;;  %v1209_v24 = vsel %vm4530_vm5, %v3775_v13, %v1208_v5  ;;  %v564_v34 = vshll.u32 %v4578_v19, 16 }
  0x49   : > { %1703 = vmatpush.bf16.msrb.mxu3 %v4181_v45  ;;  %v1202_v45 = vsel %vm4530_vm5, %v3774_v25, %v1201_v18  ;;  %v552_v18 = vrot.slane %v550_v9, 5  ;;  %v1212_v25 = vsel %vm4530_vm5, %v1210_v14, %v1211_v15 }
  0x4a   : > { %1002 = vmatpush.bf16.msrb.mxu1 %v4165_v46  ;;  %1981 = vmatpush.bf16.msrb.mxu0 %v4189_v47  ;;  %v1205_v46 = vsel %vm4530_vm5, %v1203_v35, %v1204_v36  ;;  %v531_v47 = vshrl.u32 %v4536_v38, 16  ;;  %v1328_v57 = vunpack.c.l.b16 %v1202_v45  ;;  %v568_v35 = vshrl.u32 %v4578_v19, 16 }
  0x4b   : > { %396 = vmatmul.bf16.gmra.mxu1 %v4469_v48  ;;  %416 = vmatmul.bf16.gmra.mxu2 %v4149_v49  ;;  %v534_v49 = vshll.u32 %v4536_v38, 16  ;;  %v1329_v58 = vunpack.c.l.b16 %v1205_v46  ;;  %v1330_v36 = vunpack.c.l.b16 %v1209_v24  ;;  %v1331_v40 = vunpack.c.l.b16 %v1212_v25 }
  0x4c   : > { %436 = vmatmul.bf16.gmra.mxu3 %v4153_v50  ;;  %2492 = vmatpush.bf16.msra.mxu2 %v4212_v54  ;;  %v540_v50 = vshll.u32 %v4539_v39, 16  ;;  %v529_v54 = vsel %vm4525_vm4, %v524_v41, %v528_v42  ;;  %v566_v45 = vrot.slane %v564_v34, 5  ;;  %v570_v46 = vrot.slane %v568_v35, 4 }
  0x4d   : > { %376 = vmatmul.bf16.gmra.mxu0 %v4474_v51  ;;  %2770 = vmatpush.bf16.msra.mxu3 %v4220_v55  ;;  %v883_v55 = vunpack.c.l.b16 %v495_v43  ;;  %v536_v60 = vrot.slane %v534_v49, 5  ;;  %v886_v2 = vunpack.c.l.b16 %v529_v54  ;;  %v1360_v6 = vpack.c.b16 %v1329_v58, %v1328_v57 }
  0x4e   : > { %2236 = vmatpush.bf16.msra.mxu1 %v4204_v56  ;;  %3032 = vmatpush.bf16.msra.mxu0 %v4228_v59  ;;  %v884_v56 = vunpack.c.l.b16 %v505_v44  ;;  %v533_v59 = vrot.slane %v531_v47, 4  ;;  %v542_v61 = vrot.slane %v540_v50, 5  ;;  %v155_v47 = vld [vmem:[%s4347_s30 + $0x2c] sm:$0x1]  ;;  %v4596_v49 = vpack.c.b16 %v1331_v40, %v1330_v36 }
  0x4f   : > { %v916_v12 = vpack.c.b16 %v886_v2, %v885_v1  ;;  %v1215_v50 = vrot.slane %v4539_v39, 5  ;;  %v571_v54 = vor.u32 %v570_v46, %v566_v45  ;;  %v1218_v58 = vrot.slane %v4558_v3, 5 }
  0x50   : > { %v915_v4 = vpack.c.b16 %v884_v56, %v883_v55  ;;  %v537_v7 = vor.u32 %v536_v60, %v533_v59  ;;  %v547_v8 = vor.u32 %v546_v0, %v542_v61  ;;  %2493 = vmatpush.bf16.msra.mxu2 %v4211_v63  ;;  %v574_v55 = vshll.u32 %v155_v47, 16  ;;  %v4610_v0 = vld [vmem:[%s4347_s30 + $0x34] sm:$0xf] }
  0x51   : > { %v3776_v56 = vrot.slane %v4536_v38, 9  ;;  %v1217_v57 = vrot.slane %v1215_v50, 4  ;;  %v572_v39 = vrot.slane %v571_v54, 4  ;;  %v588_v5 = vshll.u32 %v4610_v0, 16 }
  0x52   : > { %v538_v16 = vrot.slane %v537_v7, 4  ;;  %v548_v17 = vrot.slane %v547_v8, 4  ;;  %2237 = vmatpush.bf16.msra.mxu1 %v4203_v62  ;;  %v576_v60 = vrot.slane %v574_v55, 5 }
  0x53   : > { %v1216_v1 = vsel %vm4530_vm5, %v3776_v56, %v1215_v50  ;;  %v1219_v38 = vsel %vm4530_vm5, %v1217_v57, %v1218_v58  ;;  %v590_v15 = vrot.slane %v588_v5, 5  ;;  %v4226_v50 = vld [vmem:[%s5810_s1 + $0x228] sm:$0xff] }
  0x54   : > { %v543_v26 = vsel %vm4525_vm4, %v538_v16, %v542_v61  ;;  %v553_v27 = vsel %vm4525_vm4, %v548_v17, %v552_v18  ;;  %v4607_v61 = vld [vmem:[%s4347_s30 + $0x30] sm:$0xf]  ;;  %v577_v2 = vsel %vm4525_vm4, %v572_v39, %v576_v60  ;;  %v1332_v7 = vunpack.c.l.b16 %v1216_v1  ;;  %v4626_v18 = vld [vmem:[%s4347_s30 + $0x38] sm:$0x1]  ;;  %v4669_v60 = vld [vmem:[%s4347_s30 + $0x44] sm:$0x1] }
  0x55   : > { %v887_v41 = vunpack.c.l.b16 %v543_v26  ;;  %v888_v42 = vunpack.c.l.b16 %v553_v27  ;;  %v579_v3 = vshrl.u32 %v4607_v61, 16  ;;  %v1333_v8 = vunpack.c.l.b16 %v1219_v38 }
  0x56   : > { %v1222_v17 = vrot.slane %v4578_v19, 5  ;;  %v598_v24 = vshll.u32 %v4626_v18, 16  ;;  %v1225_v27 = vrot.slane %v155_v47, 5  ;;  %v4637_v19 = vld [vmem:[%s4347_s30 + $0x3c] sm:$0xf]  ;;  %v1229_v1 = vrot.slane %v4610_v0, 5 }
  0x57   : > { %v4599_v52 = vpack.c.b16 %v888_v42, %v887_v41  ;;  %v581_v13 = vrot.slane %v579_v3, 4  ;;  %v4628_v63 = vpack.c.b16 %v1333_v8, %v1332_v7  ;;  %v603_v41 = vshrl.u32 %v4637_v19, 16 }
  0x58   : > { %v1224_v26 = vrot.slane %v1222_v17, 4  ;;  %v600_v36 = vrot.slane %v598_v24, 5  ;;  %v606_v42 = vshll.u32 %v4637_v19, 16  ;;  %v622_v3 = vshll.u32 %v4669_v60, 16 }
  0x59   : > { %v605_v55 = vrot.slane %v603_v41, 4  ;;  %v3778_v5 = vrot.slane %v4607_v61, 9  ;;  %v1232_v7 = vrot.slane %v4626_v18, 5 }
  0x5a   : > { %v608_v56 = vrot.slane %v606_v42, 5 }
  0x5b   : > { %401 = vmatmul.bf16.gmra.mxu1 %v4516_v20  ;;  %421 = vmatmul.bf16.gmra.mxu2 %v4150_v21  ;;  %v4219_v21 = vld [vmem:[%s5810_s1 + $0x1f0] sm:$0xff] }
  0x5c   : > { %441 = vmatmul.bf16.gmra.mxu3 %v4154_v22  ;;  %v4575_v22 = vld [vmem:[%s4347_s30 + $0x24] sm:$0xf] }
  0x5d   : > { %381 = vmatmul.bf16.gmra.mxu0 %v4521_v23  ;;  %2771 = vmatpush.bf16.msra.mxu3 %v4219_v21  ;;  %v555_v28 = vshrl.u32 %v4575_v22, 16  ;;  %v558_v32 = vshll.u32 %v4575_v22, 16  ;;  %v3777_v25 = vrot.slane %v4575_v22, 9  ;;  %v4218_v22 = vld [vmem:[%s5810_s1 + $0x1e8] sm:$0xff] }
  0x5f   : > { %v557_v43 = vrot.slane %v555_v28, 4  ;;  %v560_v44 = vrot.slane %v558_v32, 5  ;;  %v4210_v28 = vld [vmem:[%s5810_s1 + $0x1a8] sm:$0xff]  ;;  %v4645_v32 = vld [vmem:[%s4347_s30 + $0x40] sm:$0xf]  ;;  %v1223_v40 = vsel %vm4530_vm5, %v3777_v25, %v1222_v17 }
  0x60   : > { %2494 = vmatpush.bf16.msra.mxu2 %v4210_v28 }
  0x61   : > { %v561_v53 = vor.u32 %v560_v44, %v557_v43  ;;  %2772 = vmatpush.bf16.msra.mxu3 %v4218_v22  ;;  %v612_v43 = vshll.u32 %v4645_v32, 16  ;;  %v616_v44 = vshrl.u32 %v4645_v32, 16 }
  0x63   : > { %v562_v59 = vrot.slane %v561_v53, 4  ;;  %v1334_v53 = vunpack.c.l.b16 %v1223_v40  ;;  %v614_v57 = vrot.slane %v612_v43, 5  ;;  %v618_v58 = vrot.slane %v616_v44, 4 }
  0x64   : > { %v1236_v40 = vrot.slane %v4645_v32, 5  ;;  %v1239_v32 = vrot.slane %v4669_v60, 5 }
  0x6b   : > { %1003 = vmatmul.bf16.vlgmr.msrb.gmra.mxu1 %v915_v4  ;;  %1448 = vmatmul.bf16.vlgmr.msrb.gmra.mxu2 %v1360_v6  ;;  %v582_v4 = vshll.u32 %v4607_v61, 16  ;;  %v592_v6 = vshrl.u32 %v4610_v0, 16  ;;  %v1230_v61 = vsel %vm4530_vm5, %v3778_v5, %v1229_v1 }
  0x6c   : > { %1704 = vmatmul.bf16.vlgmr.msrb.gmra.mxu3 %v4421_v33  ;;  %v4227_v33 = vld [vmem:[%s5810_s1 + $0x230] sm:$0xff] }
  0x6d   : > { %1982 = vmatmul.bf16.vlgmr.msrb.gmra.mxu0 %v916_v12  ;;  %v584_v14 = vrot.slane %v582_v4, 5  ;;  %v594_v16 = vrot.slane %v592_v6, 4  ;;  %v1231_v6 = vrot.slane %v1229_v1, 4 }
  0x6e   : > { %3033 = vmatpush.bf16.msra.mxu0 %v4227_v33 }
  0x6f   : > { %v585_v62 = vor.u32 %v584_v14, %v581_v13  ;;  %v595_v33 = vor.u32 %v594_v16, %v590_v15  ;;  %v4687_v13 = vld [vmem:[%s4347_s30 + $0x4c] sm:$0xf]  ;;  %v1233_v14 = vsel %vm4530_vm5, %v1231_v6, %v1232_v7 }
  0x70   : > { %v636_v18 = vshll.u32 %v4687_v13, 16  ;;  %v1337_v24 = vunpack.c.l.b16 %v1233_v14 }
  0x71   : > { %v586_v34 = vrot.slane %v585_v62, 4  ;;  %v596_v35 = vrot.slane %v595_v33, 4  ;;  %v640_v62 = vshrl.u32 %v4687_v13, 16  ;;  %v1336_v33 = vunpack.c.l.b16 %v1230_v61 }
  0x72   : > { %3034 = vmatpush.bf16.msra.mxu0 %v4226_v50  ;;  %v638_v22 = vrot.slane %v636_v18, 5 }
  0x73   : > { %v591_v46 = vsel %vm4525_vm4, %v586_v34, %v590_v15  ;;  %v601_v47 = vsel %vm4525_vm4, %v596_v35, %v600_v36  ;;  %v642_v34 = vrot.slane %v640_v62, 4  ;;  %v4702_v35 = vld [vmem:[%s4347_s30 + $0x50] sm:$0x1]  ;;  %v4704_v36 = vpack.c.b16 %v1337_v24, %v1336_v33  ;;  %v4762_v24 = vld [vmem:[%s4347_s30 + $0x5c] sm:$0x1] }
  0x74   : > { %v892_v39 = vunpack.c.l.b16 %v601_v47  ;;  %v646_v44 = vshll.u32 %v4702_v35, 16  ;;  %v1238_v47 = vrot.slane %v1236_v40, 4  ;;  %v1243_v33 = vrot.slane %v4687_v13, 5 }
  0x75   : > { %v643_v43 = vor.u32 %v642_v34, %v638_v22 }
  0x76   : > { %v1240_v1 = vsel %vm4530_vm5, %v1238_v47, %v1239_v32  ;;  %v4785_v47 = vld [vmem:[%s4347_s30 + $0x64] sm:$0xf] }
  0x77   : > { %v1339_v61 = vunpack.c.l.b16 %v1240_v1 }
  0x7b   : > { %1008 = vmatmul.bf16.gmra.mxu1 %v916_v12  ;;  %1453 = vmatmul.bf16.gmra.mxu2 %v4596_v49  ;;  %v890_v12 = vunpack.c.l.b16 %v577_v2  ;;  %v619_v2 = vor.u32 %v618_v58, %v614_v57 }
  0x7c   : > { %1709 = vmatmul.bf16.gmra.mxu3 %v4474_v51  ;;  %v567_v51 = vsel %vm4525_vm4, %v562_v59, %v566_v45  ;;  %v4202_v45 = vld [vmem:[%s5810_s1 + $0x168] sm:$0xff]  ;;  %v891_v59 = vunpack.c.l.b16 %v591_v46  ;;  %v3779_v46 = vrot.slane %v4637_v19, 9  ;;  %v4729_v19 = vld [vmem:[%s4347_s30 + $0x54] sm:$0xf] }
  0x7d   : > { %1987 = vmatmul.bf16.gmra.mxu0 %v4599_v52  ;;  %v889_v9 = vunpack.c.l.b16 %v567_v51  ;;  %2238 = vmatpush.bf16.msra.mxu1 %v4202_v45  ;;  %v609_v51 = vor.u32 %v608_v56, %v605_v55  ;;  %v620_v8 = vrot.slane %v619_v2, 4  ;;  %v4209_v55 = vld [vmem:[%s5810_s1 + $0x1a0] sm:$0xff]  ;;  %v651_v5 = vshrl.u32 %v4729_v19, 16 }
  0x7e   : > { %v4675_v4 = vpack.c.b16 %v892_v39, %v891_v59  ;;  %v4217_v56 = vld [vmem:[%s5810_s1 + $0x1e0] sm:$0xff]  ;;  %2495 = vmatpush.bf16.msra.mxu2 %v4209_v55  ;;  %v1237_v60 = vsel %vm4530_vm5, %v3779_v46, %v1236_v40  ;;  %v654_v6 = vshll.u32 %v4729_v19, 16 }
  0x7f   : > { %v4630_v21 = vpack.c.b16 %v890_v12, %v889_v9  ;;  %v610_v0 = vrot.slane %v609_v51, 4  ;;  %v624_v9 = vrot.slane %v622_v3, 5  ;;  %v4684_v12 = vld [vmem:[%s4347_s30 + $0x48] sm:$0xf]  ;;  %2773 = vmatpush.bf16.msra.mxu3 %v4217_v56  ;;  %v4201_v59 = vld [vmem:[%s5810_s1 + $0x160] sm:$0xff] }
  0x80   : > { %v630_v17 = vshll.u32 %v4684_v12, 16  ;;  %v3780_v13 = vrot.slane %v4684_v12, 9  ;;  %v4782_v46 = vld [vmem:[%s4347_s30 + $0x60] sm:$0xf] }
  0x81   : > { %v615_v15 = vsel %vm4525_vm4, %v610_v0, %v614_v57  ;;  %v625_v16 = vsel %vm4525_vm4, %v620_v8, %v624_v9  ;;  %2239 = vmatpush.bf16.msra.mxu1 %v4201_v59  ;;  %v4225_v8 = vld [vmem:[%s5810_s1 + $0x220] sm:$0xff]  ;;  %v1338_v9 = vunpack.c.l.b16 %v1237_v60  ;;  %v678_v56 = vshll.u32 %v4782_v46, 16 }
  0x82   : > { %v893_v25 = vunpack.c.l.b16 %v615_v15  ;;  %v632_v28 = vrot.slane %v630_v17, 5  ;;  %3035 = vmatpush.bf16.msra.mxu0 %v4225_v8  ;;  %v684_v59 = vshll.u32 %v4785_v47, 16  ;;  %v688_v60 = vshrl.u32 %v4785_v47, 16 }
  0x83   : > { %v680_v8 = vrot.slane %v678_v56, 5  ;;  %v4837_v56 = vld [vmem:[%s4347_s30 + $0x6c] sm:$0xf] }
  0x8b   : > { %1013 = vmatmul.bf16.gmra.mxu1 %v4599_v52  ;;  %1458 = vmatmul.bf16.gmra.mxu2 %v4628_v63 }
  0x8c   : > { %1714 = vmatmul.bf16.gmra.mxu3 %v4521_v23  ;;  %v1226_v23 = vsel %vm4530_vm5, %v1224_v26, %v1225_v27  ;;  %v894_v26 = vunpack.c.l.b16 %v625_v16  ;;  %v653_v16 = vrot.slane %v651_v5, 4 }
  0x8d   : > { %1992 = vmatmul.bf16.gmra.mxu0 %v4630_v21  ;;  %v1335_v54 = vunpack.c.l.b16 %v1226_v23 }
  0x8e   : > { %v4709_v41 = vpack.c.b16 %v894_v26, %v893_v25  ;;  %v4766_v26 = vpack.c.b16 %v1339_v61, %v1338_v9  ;;  %v686_v9 = vrot.slane %v684_v59, 5  ;;  %v690_v61 = vrot.slane %v688_v60, 4  ;;  %v4840_v59 = vld [vmem:[%s4347_s30 + $0x70] sm:$0xf] }
  0x8f   : > { %v4672_v38 = vpack.c.b16 %v1335_v54, %v1334_v53  ;;  %v644_v53 = vrot.slane %v643_v43, 4  ;;  %v648_v54 = vrot.slane %v646_v44, 5  ;;  %v1245_v43 = vrot.slane %v1243_v33, 4 }
  0x90   : > { %5838 = vst [vmem:[#allocation5_spill] sm:$0xff] %v4766_v26  ;;  %v1246_v44 = vrot.slane %v4702_v35, 5 }
  0x91   : > { %v649_v2 = vsel %vm4525_vm4, %v644_v53, %v648_v54 }
  0x92   : > { %v896_v15 = vunpack.c.l.b16 %v649_v2  ;;  %v1247_v35 = vsel %vm4530_vm5, %v1245_v43, %v1246_v44 }
  0x9b   : > { %1018 = vmatmul.bf16.gmra.mxu1 %v4630_v21  ;;  %1463 = vmatmul.bf16.gmra.mxu2 %v4672_v38 }
  0x9c   : > { %1719 = vmatmul.bf16.gmra.mxu3 %v4356_v10  ;;  %v627_v10 = vshrl.u32 %v4684_v12, 16  ;;  %v1244_v12 = vsel %vm4530_vm5, %v3780_v13, %v1243_v33 }
  0x9d   : > { %1997 = vmatmul.bf16.gmra.mxu0 %v4675_v4 }
  0x9e   : > { %v629_v27 = vrot.slane %v627_v10, 4  ;;  %v656_v10 = vrot.slane %v654_v6, 5  ;;  %v1340_v6 = vunpack.c.l.b16 %v1244_v12 }
  0xa0   : > { %v633_v42 = vor.u32 %v632_v28, %v629_v27  ;;  %v657_v34 = vor.u32 %v656_v10, %v653_v16  ;;  %v4808_v16 = vld [vmem:[%s4347_s30 + $0x68] sm:$0x1] }
  0xa2   : > { %v634_v50 = vrot.slane %v633_v42, 4  ;;  %v670_v42 = vshll.u32 %v4762_v24, 16  ;;  %v658_v32 = vrot.slane %v657_v34, 4 }
  0xa4   : > { %v639_v51 = vsel %vm4525_vm4, %v634_v50, %v638_v22  ;;  %v672_v53 = vrot.slane %v670_v42, 5  ;;  %v694_v42 = vshll.u32 %v4808_v16, 16 }
  0xa5   : > { %v895_v14 = vunpack.c.l.b16 %v639_v51 }
  0xa7   : > { %v4770_v28 = vpack.c.b16 %v896_v15, %v895_v14 }
  0xa8   : > { %v4707_v23 = vpop.f32.mrf.mxu1 }
  0xa9   : > { %5839 = vst [vmem:[#allocation6_spill] sm:$0xff] %v4770_v28 }
  0xaa   : > { %v4712_v45 = vpop.f32.mrf.mxu0 }
  0xab   : > { %1023 = vmatmul.bf16.gmra.mxu1 %v4675_v4  ;;  %1468 = vmatmul.bf16.gmra.mxu2 %v4704_v36 }
  0xac   : > { %1724 = vmatmul.bf16.gmra.mxu3 %v4414_v30  ;;  %v4732_v30 = vld [vmem:[%s4347_s30 + $0x58] sm:$0xf] }
  0xad   : > { %2002 = vmatmul.bf16.gmra.mxu0 %v4709_v41  ;;  %v660_v7 = vshll.u32 %v4732_v30, 16  ;;  %v664_v0 = vshrl.u32 %v4732_v30, 16 }
  0xae   : > { %v4726_v57 = vpop.f32.mrf.mxu2 }
  0xaf   : > { %v4734_v58 = vpop.f32.mrf.mxu3  ;;  %v662_v17 = vrot.slane %v660_v7, 5  ;;  %v666_v18 = vrot.slane %v664_v0, 4  ;;  %v1341_v7 = vunpack.c.l.b16 %v1247_v35  ;;  %v696_v35 = vrot.slane %v694_v42, 5 }
  0xb0   : > { %5836 = vst [vmem:[#allocation3_spill] sm:$0xff] %v4734_v58  ;;  %v4739_v39 = vpop.f32.mrf.mxu1 }
  0xb1   : > { %v667_v40 = vor.u32 %v666_v18, %v662_v17  ;;  %v663_v2 = vsel %vm4525_vm4, %v658_v32, %v662_v17  ;;  %v1250_v18 = vrot.slane %v4732_v30, 5  ;;  %v4815_v17 = vpack.c.b16 %v1341_v7, %v1340_v6 }
  0xb2   : > { %v4749_v3 = vpop.f32.mrf.mxu0  ;;  %v897_v14 = vunpack.c.l.b16 %v663_v2  ;;  %v3781_v32 = vrot.slane %v4729_v19, 9  ;;  %v1253_v30 = vrot.slane %v4762_v24, 5  ;;  %v4216_v19 = vld [vmem:[%s5810_s1 + $0x1d8] sm:$0xff] }
  0xb3   : > { %v668_v50 = vrot.slane %v667_v40, 4  ;;  %5842 = vst [vmem:[#allocation9_spill] sm:$0xff] %v4815_v17  ;;  %v691_v40 = vor.u32 %v690_v61, %v686_v9  ;;  %2774 = vmatpush.bf16.msra.mxu3 %v4216_v19  ;;  %v708_v61 = vshll.u32 %v4840_v59, 16 }
  0xb5   : > { %v673_v5 = vsel %vm4525_vm4, %v668_v50, %v672_v53  ;;  %v1252_v50 = vrot.slane %v1250_v18, 4  ;;  %v692_v12 = vrot.slane %v691_v40, 4 }
  0xb6   : > { %v4758_v62 = vpop.f32.mrf.mxu2  ;;  %v898_v15 = vunpack.c.l.b16 %v673_v5 }
  0xb7   : > { %v4764_v25 = vpop.f32.mrf.mxu3  ;;  %v1254_v2 = vsel %vm4530_vm5, %v1252_v50, %v1253_v30  ;;  %v697_v6 = vsel %vm4525_vm4, %v692_v12, %v696_v35  ;;  %v4869_v35 = vld [vmem:[%s4347_s30 + $0x74] sm:$0x1] }
  0xb8   : > { %5837 = vst [vmem:[#allocation4_spill] sm:$0xff] %v4764_v25  ;;  %v4768_v27 = vpop.f32.mrf.mxu1  ;;  %v4820_v43 = vpack.c.b16 %v898_v15, %v897_v14  ;;  %v712_v14 = vshrl.u32 %v4840_v59, 16  ;;  %v1343_v40 = vunpack.c.l.b16 %v1254_v2 }
  0xba   : > { %v4772_v22 = vpop.f32.mrf.mxu0  ;;  %5843 = vst [vmem:[#allocation10_spill] sm:$0xff] %v4820_v43  ;;  %v714_v12 = vrot.slane %v712_v14, 4 }
  0xbb   : > { %1028 = vmatmul.bf16.gmra.mxu1 %v4709_v41  ;;  %1473 = vmatmul.bf16.gmra.mxu2 %v4766_v26 }
  0xbc   : > { %1729 = vmatmul.bf16.gmra.mxu3 %v4469_v48  ;;  %v675_v48 = vshrl.u32 %v4782_v46, 16 }
  0xbd   : > { %2007 = vmatmul.bf16.gmra.mxu0 %v4770_v28 }
  0xbe   : > { %v4787_v54 = vpop.f32.mrf.mxu2  ;;  %v677_v0 = vrot.slane %v675_v48, 4  ;;  %v4208_v48 = vld [vmem:[%s5810_s1 + $0x198] sm:$0xff] }
  0xbf   : > { %v4793_v55 = vpop.f32.mrf.mxu3  ;;  %2496 = vmatpush.bf16.msra.mxu2 %v4208_v48 }
  0xc0   : > { %5840 = vst [vmem:[#allocation7_spill] sm:$0xff] %v4793_v55  ;;  %v4799_v1 = vpop.f32.mrf.mxu1  ;;  %v681_v34 = vor.u32 %v680_v8, %v677_v0  ;;  %v699_v0 = vshrl.u32 %v4837_v56, 16  ;;  %v702_v8 = vshll.u32 %v4837_v56, 16 }
  0xc2   : > { %v4801_v51 = vpop.f32.mrf.mxu0  ;;  %v682_v53 = vrot.slane %v681_v34, 4  ;;  %v701_v50 = vrot.slane %v699_v0, 4  ;;  %v704_v30 = vrot.slane %v702_v8, 5  ;;  %v718_v0 = vshll.u32 %v4869_v35, 16 }
  0xc4   : > { %v687_v5 = vsel %vm4525_vm4, %v682_v53, %v686_v9  ;;  %v4200_v9 = vld [vmem:[%s5810_s1 + $0x158] sm:$0xff]  ;;  %v710_v53 = vrot.slane %v708_v61, 5  ;;  %v3782_v61 = vrot.slane %v4782_v46, 9 }
  0xc5   : > { %v899_v42 = vunpack.c.l.b16 %v687_v5  ;;  %2240 = vmatpush.bf16.msra.mxu1 %v4200_v9  ;;  %v705_v5 = vor.u32 %v704_v30, %v701_v50 }
  0xc6   : > { %v4810_v10 = vpop.f32.mrf.mxu2 }
  0xc7   : > { %v4813_v33 = vpop.f32.mrf.mxu3  ;;  %v706_v9 = vrot.slane %v705_v5, 4 }
  0xc8   : > { %5841 = vst [vmem:[#allocation8_spill] sm:$0xff] %v4813_v33  ;;  %v4818_v13 = vpop.f32.mrf.mxu1  ;;  %v1257_v33 = vrot.slane %v4785_v47, 5  ;;  %v1260_v47 = vrot.slane %v4808_v16, 5 }
  0xc9   : > { %v711_v16 = vsel %vm4525_vm4, %v706_v9, %v710_v53 }
  0xca   : > { %v4822_v44 = vpop.f32.mrf.mxu0  ;;  %v1259_v14 = vrot.slane %v1257_v33, 4 }
  0xcb   : > { %1033 = vmatmul.bf16.gmra.mxu1 %v4770_v28  ;;  %1478 = vmatmul.bf16.gmra.mxu2 %v4815_v17 }
  0xcc   : > { %1734 = vmatmul.bf16.gmra.mxu3 %v4516_v20  ;;  %v1251_v20 = vsel %vm4530_vm5, %v3781_v32, %v1250_v18  ;;  %v4224_v18 = vld [vmem:[%s5810_s1 + $0x218] sm:$0xff]  ;;  %v900_v32 = vunpack.c.l.b16 %v697_v6  ;;  %v715_v6 = vor.u32 %v714_v12, %v710_v53  ;;  %v1261_v46 = vsel %vm4530_vm5, %v1259_v14, %v1260_v47 }
  0xcd   : > { %2012 = vmatmul.bf16.gmra.mxu0 %v4820_v43  ;;  %v1342_v34 = vunpack.c.l.b16 %v1251_v20  ;;  %v901_v14 = vunpack.c.l.b16 %v711_v16 }
  0xce   : > { %v4842_v24 = vpop.f32.mrf.mxu2  ;;  %3036 = vmatpush.bf16.msra.mxu0 %v4224_v18  ;;  %v4880_v2 = vpack.c.b16 %v900_v32, %v899_v42  ;;  %v716_v18 = vrot.slane %v715_v6, 4  ;;  %v4894_v42 = vld [vmem:[%s4347_s30 + $0x78] sm:$0xf]  ;;  %v4897_v32 = vld [vmem:[%s4347_s30 + $0x7c] sm:$0xf] }
  0xcf   : > { %v4844_v60 = vpop.f32.mrf.mxu3  ;;  %v723_v6 = vshrl.u32 %v4894_v42, 16 }
  0xd0   : > { %5844 = vst [vmem:[#allocation11_spill] sm:$0xff] %v4844_v60  ;;  %v4854_v7 = vpop.f32.mrf.mxu1  ;;  %v4875_v60 = vpack.c.b16 %v1343_v40, %v1342_v34  ;;  %v720_v34 = vrot.slane %v718_v0, 5  ;;  %v726_v0 = vshll.u32 %v4894_v42, 16 }
  0xd1   : > { %5847 = vst [vmem:[#allocation14_spill] sm:$0xff] %v4880_v2  ;;  %v725_v55 = vrot.slane %v723_v6, 4 }
  0xd2   : > { %v4860_v15 = vpop.f32.mrf.mxu0  ;;  %5846 = vst [vmem:[#allocation13_spill] sm:$0xff] %v4875_v60  ;;  %v721_v12 = vsel %vm4525_vm4, %v716_v18, %v720_v34  ;;  %v728_v53 = vrot.slane %v726_v0, 5  ;;  %v1264_v34 = vrot.slane %v4840_v59, 5  ;;  %v3783_v59 = vrot.slane %v4837_v56, 9 }
  0xd3   : > { %v902_v47 = vunpack.c.l.b16 %v721_v12 }
  0xd4   : > { %v1266_v0 = vrot.slane %v1264_v34, 4 }
  0xd6   : > { %v4871_v48 = vpop.f32.mrf.mxu2 }
  0xd7   : > { %v4873_v19 = vpop.f32.mrf.mxu3 }
  0xd8   : > { %5845 = vst [vmem:[#allocation12_spill] sm:$0xff] %v4873_v19  ;;  %v4878_v20 = vpop.f32.mrf.mxu1  ;;  %v1345_v19 = vunpack.c.l.b16 %v1261_v46 }
  0xda   : > { %v4883_v8 = vpop.f32.mrf.mxu0 }
  0xdb   : > { %1038 = vmatmul.bf16.gmra.mxu1 %v4820_v43  ;;  %1483 = vmatmul.bf16.gmra.mxu2 %v4875_v60  ;;  %v4921_v43 = vld [vmem:[%s4347_s30 + $0x80] sm:$0x1] }
  0xdc   : > { %1739 = vmatmul.bf16.gmra.mxu3 %v4359_v11  ;;  %v1258_v11 = vsel %vm4530_vm5, %v3782_v61, %v1257_v33  ;;  %v736_v33 = vshrl.u32 %v4897_v32, 16  ;;  %v742_v6 = vshll.u32 %v4921_v43, 16 }
  0xdd   : > { %2017 = vmatmul.bf16.gmra.mxu0 %v4880_v2  ;;  %v1344_v61 = vunpack.c.l.b16 %v1258_v11  ;;  %v4927_v11 = vpack.c.b16 %v902_v47, %v901_v14  ;;  %v1265_v14 = vsel %vm4530_vm5, %v3783_v59, %v1264_v34 }
  0xde   : > { %v4891_v40 = vpop.f32.mrf.mxu2  ;;  %v738_v60 = vrot.slane %v736_v33, 4  ;;  %v1267_v33 = vrot.slane %v4869_v35, 5  ;;  %v744_v35 = vrot.slane %v742_v6, 5 }
  0xdf   : > { %5848 = vst [vmem:[#allocation15_spill] sm:$0xff] %v4891_v40  ;;  %v4899_v50 = vpop.f32.mrf.mxu3  ;;  %v4925_v58 = vpack.c.b16 %v1345_v19, %v1344_v61  ;;  %v4936_v19 = vld [vmem:[%s4347_s30 + $0x84] sm:$0xf]  ;;  %v1271_v40 = vrot.slane %v4897_v32, 5 }
  0xe0   : > { %5849 = vst [vmem:[#allocation16_spill] sm:$0xff] %v4899_v50  ;;  %v4901_v30 = vpop.f32.mrf.mxu1  ;;  %v732_v50 = vshll.u32 %v4897_v32, 16  ;;  %v747_v47 = vshrl.u32 %v4936_v19, 16 }
  0xe1   : > { %5852 = vst [vmem:[#allocation19_spill] sm:$0xff] %v4925_v58 }
  0xe2   : > { %v4911_v5 = vpop.f32.mrf.mxu0  ;;  %v734_v9 = vrot.slane %v732_v50, 5  ;;  %5853 = vst [vmem:[#allocation20_spill] sm:$0xff] %v4927_v11  ;;  %v729_v50 = vor.u32 %v728_v53, %v725_v55  ;;  %v4944_v55 = vld [vmem:[%s4347_s30 + $0x88] sm:$0xf] }
  0xe4   : > { %v739_v12 = vor.u32 %v738_v60, %v734_v9  ;;  %v730_v56 = vrot.slane %v729_v50, 4  ;;  %v760_v50 = vshrl.u32 %v4944_v55, 16 }
  0xe6   : > { %v4917_v18 = vpop.f32.mrf.mxu2  ;;  %v740_v60 = vrot.slane %v739_v12, 4  ;;  %v735_v59 = vsel %vm4525_vm4, %v730_v56, %v734_v9 }
  0xe7   : > { %5850 = vst [vmem:[#allocation17_spill] sm:$0xff] %v4917_v18  ;;  %v4923_v25 = vpop.f32.mrf.mxu3  ;;  %v903_v56 = vunpack.c.l.b16 %v735_v59 }
  0xe8   : > { %5851 = vst [vmem:[#allocation18_spill] sm:$0xff] %v4923_v25  ;;  %v1004_v17 = vpop.f32.mrf.mxu1 }
  0xe9   : > { %v1116_v46 = vadd.f32 %v1004_v17, %v4712_v45  ;;  %v4207_v45 = vld [vmem:[%s5810_s1 + $0x190] sm:$0xff] }
  0xea   : > { %v1983_v16 = vpop.f32.mrf.mxu0  ;;  %v4215_v17 = vld [vmem:[%s5810_s1 + $0x1d0] sm:$0xff]  ;;  %2497 = vmatpush.bf16.msra.mxu2 %v4207_v45  ;;  %v1346_v45 = vunpack.c.l.b16 %v1265_v14 }
  0xeb   : > { %1043 = vmatmul.bf16.gmra.mxu1 %v4880_v2  ;;  %1488 = vmatmul.bf16.gmra.mxu2 %v4925_v58  ;;  %v750_v58 = vshll.u32 %v4936_v19, 16  ;;  %v756_v2 = vshll.u32 %v4944_v55, 16 }
  0xec   : > { %1744 = vmatmul.bf16.gmra.mxu3 %v4417_v31  ;;  %v1268_v31 = vsel %vm4530_vm5, %v1266_v0, %v1267_v33  ;;  %v745_v0 = vsel %vm4525_vm4, %v740_v60, %v744_v35  ;;  %v4223_v33 = vld [vmem:[%s5810_s1 + $0x210] sm:$0xff]  ;;  %v4971_v35 = vld [vmem:[%s4347_s30 + $0x8c] sm:$0x1] }
  0xed   : > { %2022 = vmatmul.bf16.gmra.mxu0 %v4927_v11  ;;  %2775 = vmatpush.bf16.msra.mxu3 %v4215_v17  ;;  %v749_v17 = vrot.slane %v747_v47, 4  ;;  %v904_v60 = vunpack.c.l.b16 %v745_v0  ;;  %v3784_v0 = vrot.slane %v4894_v42, 9 }
  0xee   : > { %v1449_v61 = vpop.f32.mrf.mxu2  ;;  %3037 = vmatpush.bf16.msra.mxu0 %v4223_v33 }
  0xef   : > { %v1561_v53 = vadd.f32 %v1449_v61, %v1116_v46  ;;  %v1705_v25 = vpop.f32.mrf.mxu3  ;;  %v4199_v46 = vld [vmem:[%s5810_s1 + $0x150] sm:$0xff]  ;;  %v758_v61 = vrot.slane %v756_v2, 5  ;;  %v1272_v42 = vsel %vm4530_vm5, %v3784_v0, %v1271_v40 }
  0xf0   : > { %v1006_v12 = vpop.f32.mrf.mxu1  ;;  %2241 = vmatpush.bf16.msra.mxu1 %v4199_v46  ;;  %v1273_v46 = vrot.slane %v1271_v40, 4 }
  0xf1   : > { %v1817_v6 = vadd.f32 %v1705_v25, %v1561_v53  ;;  %v1117_v28 = vadd.f32 %v1006_v12, %v4749_v3  ;;  %v1347_v25 = vunpack.c.l.b16 %v1268_v31  ;;  %v752_v3 = vrot.slane %v750_v58, 5 }
  0xf2   : > { %v1985_v34 = vpop.f32.mrf.mxu0  ;;  %v762_v53 = vrot.slane %v760_v50, 4  ;;  %v766_v58 = vshll.u32 %v4971_v35, 16  ;;  %v4977_v50 = vpack.c.b16 %v904_v60, %v903_v56 }
  0xf3   : > { %v4968_v9 = vadd.f32 %v1983_v16, %v1817_v6  ;;  %v4973_v18 = vpack.c.b16 %v1347_v25, %v1346_v45  ;;  %v753_v31 = vor.u32 %v752_v3, %v749_v17  ;;  %v4987_v17 = vld [vmem:[%s4347_s30 + $0x78] sm:$0xff] }
  0xf4   : > { %v763_v47 = vor.u32 %v762_v53, %v758_v61  ;;  %v768_v45 = vrot.slane %v766_v58, 5  ;;  %5857 = vst [vmem:[#allocation24_spill] sm:$0xff] %v4987_v17 }
  0xf5   : > { %5854 = vst [vmem:[#allocation21_spill] sm:$0xff] %v4968_v9  ;;  %v754_v32 = vrot.slane %v753_v31, 4 }
  0xf6   : > { %v1451_v12 = vpop.f32.mrf.mxu2  ;;  %5855 = vst [vmem:[#allocation22_spill] sm:$0xff] %v4973_v18  ;;  %v764_v33 = vrot.slane %v763_v47, 4 }
  0xf7   : > { %v1562_v26 = vadd.f32 %v1451_v12, %v1117_v28  ;;  %v1707_v14 = vpop.f32.mrf.mxu3  ;;  %v1274_v28 = vrot.slane %v4921_v43, 5  ;;  %v759_v56 = vsel %vm4525_vm4, %v754_v32, %v758_v61 }
  0xf8   : > { %v1009_v2 = vpop.f32.mrf.mxu1  ;;  %v769_v60 = vsel %vm4525_vm4, %v764_v33, %v768_v45  ;;  %v905_v61 = vunpack.c.l.b16 %v759_v56 }
  0xf9   : > { %v1818_v16 = vadd.f32 %v1707_v14, %v1562_v26  ;;  %v1118_v6 = vadd.f32 %v1009_v2, %v4772_v22  ;;  %v4992_v26 = vld [vmem:[%s4347_s30 + $0x90] sm:$0xf]  ;;  %v4995_v22 = vld [vmem:[%s4347_s30 + $0x94] sm:$0xf] }
  0xfa   : > { %v1988_v59 = vpop.f32.mrf.mxu0  ;;  %v771_v14 = vshrl.u32 %v4992_v26, 16  ;;  %v774_v31 = vshll.u32 %v4992_v26, 16  ;;  %v780_v47 = vshll.u32 %v4995_v22, 16  ;;  %v784_v40 = vshrl.u32 %v4995_v22, 16 }
  0xfb   : > { %1048 = vmatmul.bf16.gmra.mxu1 %v4927_v11  ;;  %1493 = vmatmul.bf16.gmra.mxu2 %v4973_v18  ;;  %v4984_v25 = vadd.f32 %v1985_v34, %v1818_v16  ;;  %v1275_v34 = vsel %vm4530_vm5, %v1273_v46, %v1274_v28  ;;  %v906_v46 = vunpack.c.l.b16 %v769_v60 }
  0xfc   : > { %1749 = vmatmul.bf16.gmra.mxu3 %v4987_v17  ;;  %v1349_v0 = vunpack.c.l.b16 %v1275_v34  ;;  %v773_v32 = vrot.slane %v771_v14, 4  ;;  %v776_v33 = vrot.slane %v774_v31, 5  ;;  %v782_v45 = vrot.slane %v780_v47, 5  ;;  %v5029_v47 = vld [vmem:[%s4347_s30 + $0x84] sm:$0xff] }
  0xfd   : > { %5856 = vst [vmem:[#allocation23_spill] sm:$0xff] %v4984_v25  ;;  %2027 = vmatmul.bf16.gmra.mxu0 %v4977_v50  ;;  %v5013_v25 = vld [vmem:[%s4347_s30 + $0x98] sm:$0x1]  ;;  %v1281_v14 = vrot.slane %v4971_v35, 5  ;;  %v5040_v35 = vld [vmem:[%s4347_s30 + $0x9c] sm:$0xf] }
  0xfe   : > { %v1454_v43 = vpop.f32.mrf.mxu2  ;;  %v790_v34 = vshll.u32 %v5013_v25, 16 }
  0xff   : > { %v1563_v3 = vadd.f32 %v1454_v43, %v1118_v6  ;;  %v1710_v53 = vpop.f32.mrf.mxu3  ;;  %v1348_v6 = vunpack.c.l.b16 %v1272_v42  ;;  %v786_v43 = vrot.slane %v784_v40, 4  ;;  %v4206_v40 = vld [vmem:[%s5810_s1 + $0x188] sm:$0xff] }
 0x100   : > { %v1011_v12 = vpop.f32.mrf.mxu1  ;;  %2498 = vmatpush.bf16.msra.mxu2 %v4206_v40 }
 0x101   : > { %v1819_v58 = vadd.f32 %v1710_v53, %v1563_v3  ;;  %v1119_v2 = vadd.f32 %v1011_v12, %v4801_v51  ;;  %v5015_v11 = vpack.c.b16 %v1349_v0, %v1348_v6  ;;  %v1278_v51 = vrot.slane %v4944_v55, 5 }
 0x102   : > { %v1990_v16 = vpop.f32.mrf.mxu0  ;;  %v5018_v3 = vpack.c.b16 %v906_v46, %v905_v61  ;;  %v777_v53 = vor.u32 %v776_v33, %v773_v32 }
 0x103   : > { %v5010_v28 = vadd.f32 %v1988_v59, %v1819_v58  ;;  %v787_v59 = vor.u32 %v786_v43, %v782_v45  ;;  %v1280_v55 = vrot.slane %v1278_v51, 4  ;;  %v795_v43 = vshrl.u32 %v5040_v35, 16 }
 0x105   : > { %v1282_v61 = vsel %vm4530_vm5, %v1280_v55, %v1281_v14 }
 0x106   : > { %v1456_v17 = vpop.f32.mrf.mxu2  ;;  %v1351_v55 = vunpack.c.l.b16 %v1282_v61 }
 0x107   : > { %v1564_v9 = vadd.f32 %v1456_v17, %v1119_v2  ;;  %v1712_v18 = vpop.f32.mrf.mxu3  ;;  %v3785_v17 = vrot.slane %v4936_v19, 9  ;;  %v4214_v19 = vld [vmem:[%s5810_s1 + $0x1c8] sm:$0xff]  ;;  %v5043_v2 = vld [vmem:[%s4347_s30 + $0xa0] sm:$0xf] }
 0x108   : > { %v1014_v42 = vpop.f32.mrf.mxu1  ;;  %2776 = vmatpush.bf16.msra.mxu3 %v4214_v19 }
 0x109   : > { %v1820_v56 = vadd.f32 %v1712_v18, %v1564_v9  ;;  %v1120_v60 = vadd.f32 %v1014_v42, %v4822_v44  ;;  %v778_v44 = vrot.slane %v777_v53, 4  ;;  %v788_v18 = vrot.slane %v787_v59, 4 }
 0x10a   : > { %v1993_v12 = vpop.f32.mrf.mxu0  ;;  %v792_v9 = vrot.slane %v790_v34, 5  ;;  %v1279_v0 = vsel %vm4530_vm5, %v3785_v17, %v1278_v51  ;;  %v798_v42 = vshll.u32 %v5040_v35, 16  ;;  %v804_v51 = vshll.u32 %v5043_v2, 16 }
 0x10b   : > { %1053 = vmatmul.bf16.gmra.mxu1 %v4977_v50  ;;  %1498 = vmatmul.bf16.gmra.mxu2 %v5015_v11  ;;  %v5026_v31 = vadd.f32 %v1990_v16, %v1820_v56  ;;  %v783_v32 = vsel %vm4525_vm4, %v778_v44, %v782_v45  ;;  %v808_v56 = vshrl.u32 %v5043_v2, 16  ;;  %v4198_v45 = vld [vmem:[%s5810_s1 + $0x148] sm:$0xff]  ;;  %v1350_v17 = vunpack.c.l.b16 %v1279_v0 }
 0x10c   : > { %1754 = vmatmul.bf16.gmra.mxu3 %v5029_v47  ;;  %v793_v33 = vsel %vm4525_vm4, %v788_v18, %v792_v9  ;;  %2242 = vmatpush.bf16.msra.mxu1 %v4198_v45  ;;  %v797_v18 = vrot.slane %v795_v43, 4  ;;  %v800_v9 = vrot.slane %v798_v42, 5  ;;  %v806_v40 = vrot.slane %v804_v51, 5  ;;  %v5081_v45 = vld [vmem:[%s4347_s30 + $0xa8] sm:$0xf] }
 0x10d   : > { %5858 = vst [vmem:[#allocation25_spill] sm:$0xff] %v5026_v31  ;;  %2032 = vmatmul.bf16.gmra.mxu0 %v5018_v3  ;;  %v908_v44 = vunpack.c.l.b16 %v793_v33  ;;  %v810_v19 = vrot.slane %v808_v56, 4  ;;  %v5070_v0 = vpack.c.b16 %v1351_v55, %v1350_v17  ;;  %v3786_v51 = vrot.slane %v4992_v26, 9 }
 0x10e   : > { %v1459_v58 = vpop.f32.mrf.mxu2  ;;  %v1288_v56 = vrot.slane %v5013_v25, 5 }
 0x10f   : > { %v1565_v16 = vadd.f32 %v1459_v58, %v1120_v60  ;;  %v1715_v6 = vpop.f32.mrf.mxu3  ;;  %v4222_v60 = vld [vmem:[%s5810_s1 + $0x208] sm:$0xff]  ;;  %5860 = vst [vmem:[#allocation27_spill] sm:$0xff] %v5070_v0 }
 0x110   : > { %v1016_v46 = vpop.f32.mrf.mxu1  ;;  %3038 = vmatpush.bf16.msra.mxu0 %v4222_v60 }
 0x111   : > { %v1821_v53 = vadd.f32 %v1715_v6, %v1565_v16  ;;  %v1121_v59 = vadd.f32 %v1016_v46, %v4860_v15  ;;  %v907_v15 = vunpack.c.l.b16 %v783_v32  ;;  %v1285_v16 = vrot.slane %v4995_v22, 5  ;;  %v5068_v6 = vld [vmem:[%s4347_s30 + $0xa4] sm:$0x1] }
 0x112   : > { %v1995_v34 = vpop.f32.mrf.mxu0  ;;  %v801_v32 = vor.u32 %v800_v9, %v797_v18  ;;  %v814_v22 = vshll.u32 %v5068_v6, 16 }
 0x113   : > { %v5064_v14 = vadd.f32 %v1993_v12, %v1821_v53  ;;  %v5072_v12 = vpack.c.b16 %v908_v44, %v907_v15  ;;  %v811_v53 = vor.u32 %v810_v19, %v806_v40  ;;  %v1286_v15 = vsel %vm4530_vm5, %v3786_v51, %v1285_v16 }
 0x114   : > { %v802_v26 = vrot.slane %v801_v32, 4  ;;  %v816_v55 = vrot.slane %v814_v22, 5  ;;  %v822_v19 = vshll.u32 %v5081_v45, 16 }
 0x115   : > { %5859 = vst [vmem:[#allocation26_spill] sm:$0xff] %v5064_v14  ;;  %v812_v17 = vrot.slane %v811_v53, 4 }
 0x116   : > { %v1461_v58 = vpop.f32.mrf.mxu2 }
 0x117   : > { %v1566_v46 = vadd.f32 %v1461_v58, %v1121_v59  ;;  %v1717_v31 = vpop.f32.mrf.mxu3  ;;  %v1287_v59 = vrot.slane %v1285_v16, 4  ;;  %v807_v16 = vsel %vm4525_vm4, %v802_v26, %v806_v40  ;;  %v817_v22 = vsel %vm4525_vm4, %v812_v17, %v816_v55 }
 0x118   : > { %v1019_v61 = vpop.f32.mrf.mxu1  ;;  %v909_v14 = vunpack.c.l.b16 %v807_v16  ;;  %v1292_v40 = vrot.slane %v5043_v2, 5 }
 0x119   : > { %v1822_v33 = vadd.f32 %v1717_v31, %v1566_v46  ;;  %v1122_v43 = vadd.f32 %v1019_v61, %v4883_v8  ;;  %v5086_v31 = vld [vmem:[%s4347_s30 + $0x90] sm:$0xff]  ;;  %v5091_v8 = vld [vmem:[%s4347_s30 + $0xac] sm:$0xf]  ;;  %v1289_v44 = vsel %vm4530_vm5, %v1287_v59, %v1288_v56  ;;  %v824_v56 = vrot.slane %v822_v19, 5 }
 0x11a   : > { %v1998_v42 = vpop.f32.mrf.mxu0  ;;  %5862 = vst [vmem:[#allocation29_spill] sm:$0xff] %v5086_v31  ;;  %v828_v58 = vshll.u32 %v5091_v8, 16  ;;  %v832_v46 = vshrl.u32 %v5091_v8, 16  ;;  %v1353_v51 = vunpack.c.l.b16 %v1289_v44 }
 0x11b   : > { %1058 = vmatmul.bf16.gmra.mxu1 %v5018_v3  ;;  %1503 = vmatmul.bf16.gmra.mxu2 %v5070_v0  ;;  %v5083_v60 = vadd.f32 %v1995_v34, %v1822_v33  ;;  %v819_v34 = vshrl.u32 %v5081_v45, 16  ;;  %v910_v0 = vunpack.c.l.b16 %v817_v22  ;;  %v5136_v22 = vld [vmem:[%s4347_s30 + $0xb4] sm:$0xf] }
 0x11c   : > { %1759 = vmatmul.bf16.gmra.mxu3 %v5086_v31 }
 0x11d   : > { %5861 = vst [vmem:[#allocation28_spill] sm:$0xff] %v5083_v60  ;;  %2037 = vmatmul.bf16.gmra.mxu0 %v5072_v12  ;;  %v821_v59 = vrot.slane %v819_v34, 4  ;;  %v834_v60 = vrot.slane %v832_v46, 4  ;;  %v5115_v34 = vpack.c.b16 %v910_v0, %v909_v14  ;;  %v1294_v46 = vrot.slane %v1292_v40, 4  ;;  %v5124_v14 = vld [vmem:[%s4347_s30 + $0x9c] sm:$0xff] }
 0x11e   : > { %v1464_v25 = vpop.f32.mrf.mxu2  ;;  %5865 = vst [vmem:[#allocation32_spill] sm:$0xff] %v5124_v14 }
 0x11f   : > { %v1567_v18 = vadd.f32 %v1464_v25, %v1122_v43  ;;  %v1720_v9 = vpop.f32.mrf.mxu3  ;;  %v1352_v43 = vunpack.c.l.b16 %v1286_v15  ;;  %v830_v25 = vrot.slane %v828_v58, 5  ;;  %v825_v17 = vor.u32 %v824_v56, %v821_v59 }
 0x120   : > { %v1021_v61 = vpop.f32.mrf.mxu1  ;;  %v3787_v58 = vrot.slane %v5040_v35, 9  ;;  %v4205_v35 = vld [vmem:[%s5810_s1 + $0x180] sm:$0xff] }
 0x121   : > { %v1823_v32 = vadd.f32 %v1720_v9, %v1567_v18  ;;  %v1123_v33 = vadd.f32 %v1021_v61, %v4911_v5  ;;  %v5109_v18 = vld [vmem:[%s4347_s30 + $0xb0] sm:$0x1]  ;;  %v5111_v9 = vpack.c.b16 %v1353_v51, %v1352_v43  ;;  %v835_v55 = vor.u32 %v834_v60, %v830_v25  ;;  %2499 = vmatpush.bf16.msra.mxu2 %v4205_v35 }
 0x122   : > { %v2000_v53 = vpop.f32.mrf.mxu0  ;;  %v838_v15 = vshll.u32 %v5109_v18, 16  ;;  %v826_v2 = vrot.slane %v825_v17, 4  ;;  %v1293_v51 = vsel %vm4530_vm5, %v3787_v58, %v1292_v40  ;;  %v843_v17 = vshrl.u32 %v5136_v22, 16  ;;  %v4197_v58 = vld [vmem:[%s5810_s1 + $0x140] sm:$0xff] }
 0x123   : > { %v5106_v31 = vadd.f32 %v1998_v42, %v1823_v32  ;;  %v1295_v32 = vrot.slane %v5068_v6, 5  ;;  %v836_v60 = vrot.slane %v835_v55, 4  ;;  %v4213_v6 = vld [vmem:[%s5810_s1 + $0x1c0] sm:$0xff]  ;;  %v846_v55 = vshll.u32 %v5136_v22, 16  ;;  %2243 = vmatpush.bf16.msra.mxu1 %v4197_v58 }
 0x124   : > { %2777 = vmatpush.bf16.msra.mxu3 %v4213_v6  ;;  %v845_v35 = vrot.slane %v843_v17, 4 }
 0x125   : > { %5863 = vst [vmem:[#allocation30_spill] sm:$0xff] %v5106_v31  ;;  %v848_v6 = vrot.slane %v846_v55, 5 }
 0x126   : > { %v1466_v5 = vpop.f32.mrf.mxu2 }
 0x127   : > { %v1568_v26 = vadd.f32 %v1466_v5, %v1123_v33  ;;  %v1722_v61 = vpop.f32.mrf.mxu3  ;;  %v840_v33 = vrot.slane %v838_v15, 5  ;;  %v1296_v5 = vsel %vm4530_vm5, %v1294_v46, %v1295_v32  ;;  %v1354_v46 = vunpack.c.l.b16 %v1293_v51 }
 0x128   : > { %v1024_v44 = vpop.f32.mrf.mxu1  ;;  %v1355_v32 = vunpack.c.l.b16 %v1296_v5  ;;  %v1299_v5 = vrot.slane %v5091_v8, 5  ;;  %v5177_v8 = vld [vmem:[%s4347_s30 + $0xa8] sm:$0xff] }
 0x129   : > { %v1824_v42 = vadd.f32 %v1722_v61, %v1568_v26  ;;  %v1124_v0 = vadd.f32 %v1024_v44, %v4707_v23  ;;  %v831_v26 = vsel %vm4525_vm4, %v826_v2, %v830_v25  ;;  %v841_v23 = vsel %vm4525_vm4, %v836_v60, %v840_v33  ;;  %v4221_v25 = vld [vmem:[%s5810_s1 + $0x200] sm:$0xff] }
 0x12a   : > { %v2003_v19 = vpop.f32.mrf.mxu0  ;;  %v911_v2 = vunpack.c.l.b16 %v831_v26  ;;  %v912_v60 = vunpack.c.l.b16 %v841_v23  ;;  %3039 = vmatpush.bf16.msra.mxu0 %v4221_v25  ;;  %v5165_v51 = vpack.c.b16 %v1355_v32, %v1354_v46  ;;  %v5184_v46 = vld [vmem:[%s4347_s30 + $0xc0] sm:$0xf] }
 0x12b   : > { %1063 = vmatmul.bf16.gmra.mxu1 %v5072_v12  ;;  %1508 = vmatmul.bf16.gmra.mxu2 %v5111_v9  ;;  %v5121_v16 = vadd.f32 %v2000_v53, %v1824_v42  ;;  %v5139_v53 = vld [vmem:[%s4347_s30 + $0xb8] sm:$0xf]  ;;  %5867 = vst [vmem:[#allocation34_spill] sm:$0xff] %v5184_v46 }
 0x12c   : > { %1764 = vmatmul.bf16.gmra.mxu3 %v5124_v14  ;;  %v852_v40 = vshll.u32 %v5139_v53, 16  ;;  %v856_v15 = vshrl.u32 %v5139_v53, 16  ;;  %v5168_v23 = vpack.c.b16 %v912_v60, %v911_v2 }
 0x12d   : > { %5864 = vst [vmem:[#allocation31_spill] sm:$0xff] %v5121_v16  ;;  %2042 = vmatmul.bf16.gmra.mxu0 %v5115_v34 }
 0x12e   : > { %v1469_v43 = vpop.f32.mrf.mxu2 }
 0x12f   : > { %v1569_v59 = vadd.f32 %v1469_v43, %v1124_v0  ;;  %v1725_v56 = vpop.f32.mrf.mxu3  ;;  %v854_v0 = vrot.slane %v852_v40, 5  ;;  %v858_v43 = vrot.slane %v856_v15, 4 }
 0x130   : > { %v1026_v61 = vpop.f32.mrf.mxu1 }
 0x131   : > { %v1825_v44 = vadd.f32 %v1725_v56, %v1569_v59  ;;  %v1125_v59 = vadd.f32 %v1026_v61, %v4739_v39  ;;  %v5163_v56 = vld [vmem:[%s4347_s30 + $0xbc] sm:$0x1]  ;;  %v859_v17 = vor.u32 %v858_v43, %v854_v0  ;;  %v1301_v61 = vrot.slane %v1299_v5, 4 }
 0x132   : > { %v2005_v42 = vpop.f32.mrf.mxu0  ;;  %v862_v55 = vshll.u32 %v5163_v56, 16  ;;  %v1882_v43 = vshrl.u32 %v5184_v46, 16 }
 0x133   : > { %v5159_v33 = vadd.f32 %v2003_v19, %v1825_v44  ;;  %v849_v19 = vor.u32 %v848_v6, %v845_v35  ;;  %v1302_v44 = vrot.slane %v5109_v18, 5 }
 0x134   : > { %v864_v58 = vrot.slane %v862_v55, 5 }
 0x135   : > { %v1303_v6 = vsel %vm4530_vm5, %v1301_v61, %v1302_v44  ;;  %v1884_v44 = vrot.slane %v1882_v43, 4 }
 0x136   : > { %v1471_v16 = vpop.f32.mrf.mxu2 }
 0x137   : > { %v1570_v14 = vadd.f32 %v1471_v16, %v1125_v59  ;;  %v1727_v31 = vpop.f32.mrf.mxu3  ;;  %v3788_v16 = vrot.slane %v5081_v45, 9  ;;  %v5187_v45 = vld [vmem:[%s4347_s30 + $0xc4] sm:$0xf] }
 0x138   : > { %v1029_v26 = vpop.f32.mrf.mxu1 }
 0x139   : > { %v1826_v40 = vadd.f32 %v1727_v31, %v1570_v14  ;;  %v850_v31 = vrot.slane %v849_v19, 4  ;;  %v860_v14 = vrot.slane %v859_v17, 4  ;;  %v1126_v25 = vadd.f32 %v1029_v26, %v4768_v27 }
 0x13a   : > { %v2008_v39 = vpop.f32.mrf.mxu0  ;;  %v1300_v60 = vsel %vm4530_vm5, %v3788_v16, %v1299_v5  ;;  %v1885_v19 = vshll.u32 %v5184_v46, 16  ;;  %v1891_v17 = vshll.u32 %v5187_v45, 16  ;;  %v1895_v5 = vshrl.u32 %v5187_v45, 16 }
 0x13b   : > { %1068 = vmatmul.bf16.gmra.mxu1 %v5115_v34  ;;  %1513 = vmatmul.bf16.gmra.mxu2 %v5165_v51  ;;  %v5174_v15 = vadd.f32 %v2005_v42, %v1826_v40  ;;  %v855_v18 = vsel %vm4525_vm4, %v850_v31, %v854_v0  ;;  %v865_v27 = vsel %vm4525_vm4, %v860_v14, %v864_v58  ;;  %v1356_v55 = vunpack.c.l.b16 %v1300_v60 }
 0x13c   : > { %1769 = vmatmul.bf16.gmra.mxu3 %v5177_v8  ;;  %v1357_v40 = vunpack.c.l.b16 %v1303_v6  ;;  %v913_v61 = vunpack.c.l.b16 %v855_v18  ;;  %v914_v0 = vunpack.c.l.b16 %v865_v27  ;;  %v1887_v14 = vrot.slane %v1885_v19, 5  ;;  %v5218_v19 = vld [vmem:[%s4347_s30 + $0xb4] sm:$0xff] }
 0x13d   : > { %5866 = vst [vmem:[#allocation33_spill] sm:$0xff] %v5174_v15  ;;  %2047 = vmatmul.bf16.gmra.mxu0 %v5168_v23  ;;  %v1893_v58 = vrot.slane %v1891_v17, 5  ;;  %v1309_v17 = vrot.slane %v5163_v56, 5 }
 0x13e   : > { %v1474_v32 = vpop.f32.mrf.mxu2  ;;  %v5207_v15 = vpack.c.b16 %v1357_v40, %v1356_v55  ;;  %v5209_v6 = vpack.c.b16 %v914_v0, %v913_v61  ;;  %v1888_v43 = vor.u32 %v1887_v14, %v1884_v44 }
 0x13f   : > { %v1571_v42 = vadd.f32 %v1474_v32, %v1126_v25  ;;  %v1730_v2 = vpop.f32.mrf.mxu3  ;;  %v1897_v25 = vrot.slane %v1895_v5, 4 }
 0x140   : > { %v1031_v35 = vpop.f32.mrf.mxu1  ;;  %v1889_v55 = vrot.slane %v1888_v43, 4 }
 0x141   : > { %v1827_v59 = vadd.f32 %v1730_v2, %v1571_v42  ;;  %v1127_v31 = vadd.f32 %v1031_v35, %v4799_v1  ;;  %v5205_v42 = vld [vmem:[%s4347_s30 + $0xc8] sm:$0x1]  ;;  %v1898_v1 = vor.u32 %v1897_v25, %v1893_v58 }
 0x142   : > { %v2010_v26 = vpop.f32.mrf.mxu0  ;;  %v1901_v35 = vshll.u32 %v5205_v42, 16  ;;  %v1894_v56 = vsel %vm4525_vm4, %v1889_v55, %v1893_v58 }
 0x143   : > { %v5201_v16 = vadd.f32 %v2008_v39, %v1827_v59  ;;  %v1306_v39 = vrot.slane %v5139_v53, 5  ;;  %v3789_v53 = vrot.slane %v5136_v22, 9  ;;  %v1899_v40 = vrot.slane %v1898_v1, 4 }
 0x144   : > { %v1903_v61 = vrot.slane %v1901_v35, 5  ;;  %v1922_v43 = vunpack.c.l.b16 %v1894_v56 }
 0x145   : > { %v1307_v14 = vsel %vm4530_vm5, %v3789_v53, %v1306_v39 }
 0x146   : > { %v1476_v32 = vpop.f32.mrf.mxu2 }
 0x147   : > { %v1572_v2 = vadd.f32 %v1476_v32, %v1127_v31  ;;  %v1732_v46 = vpop.f32.mrf.mxu3 }
 0x148   : > { %v1034_v60 = vpop.f32.mrf.mxu1 }
 0x149   : > { %v1828_v18 = vadd.f32 %v1732_v46, %v1572_v2  ;;  %v1308_v46 = vrot.slane %v1306_v39, 4  ;;  %v1128_v5 = vadd.f32 %v1034_v60, %v4818_v13  ;;  %v1904_v13 = vsel %vm4525_vm4, %v1899_v40, %v1903_v61 }
 0x14a   : > { %v2013_v27 = vpop.f32.mrf.mxu0  ;;  %v1358_v2 = vunpack.c.l.b16 %v1307_v14  ;;  %v1923_v1 = vunpack.c.l.b16 %v1904_v13 }
 0x14b   : > { %1073 = vmatmul.bf16.gmra.mxu1 %v5168_v23  ;;  %1518 = vmatmul.bf16.gmra.mxu2 %v5207_v15  ;;  %v5215_v59 = vadd.f32 %v2010_v26, %v1828_v18  ;;  %v1310_v25 = vsel %vm4530_vm5, %v1308_v46, %v1309_v17 }
 0x14c   : > { %1774 = vmatmul.bf16.gmra.mxu3 %v5218_v19  ;;  %v1359_v60 = vunpack.c.l.b16 %v1310_v25  ;;  %v5241_v58 = vpack.c.b16 %v1923_v1, %v1922_v43 }
 0x14d   : > { %2052 = vmatmul.bf16.gmra.mxu0 %v5209_v6 }
 0x14e   : > { %v1479_v0 = vpop.f32.mrf.mxu2  ;;  %v5236_v17 = vpack.c.b16 %v1359_v60, %v1358_v2 }
 0x14f   : > { %v1573_v44 = vadd.f32 %v1479_v0, %v1128_v5  ;;  %v1735_v26 = vpop.f32.mrf.mxu3  ;;  %v5239_v0 = vld [vmem:[%s4347_s30 + $0xc0] sm:$0xff] }
 0x150   : > { %v1036_v31 = vpop.f32.mrf.mxu1 }
 0x151   : > { %v1829_v22 = vadd.f32 %v1735_v26, %v1573_v44  ;;  %v1129_v39 = vadd.f32 %v1036_v31, %v4854_v7 }
 0x152   : > { %v2015_v32 = vpop.f32.mrf.mxu0 }
 0x153   : > { %v5233_v18 = vadd.f32 %v2013_v27, %v1829_v22 }
 0x156   : > { %v1481_v35 = vpop.f32.mrf.mxu2 }
 0x157   : > { %v1574_v53 = vadd.f32 %v1481_v35, %v1129_v39  ;;  %v1737_v46 = vpop.f32.mrf.mxu3 }
 0x158   : > { %v1039_v5 = vpop.f32.mrf.mxu1 }
 0x159   : > { %v1830_v55 = vadd.f32 %v1737_v46, %v1574_v53  ;;  %v1130_v7 = vadd.f32 %v1039_v5, %v4878_v20  ;;  %v4273_v20 = vld [vmem:[%s4347_s30 + $0x18] sm:$0xff] }
 0x15a   : > { %v2018_v40 = vpop.f32.mrf.mxu0 }
 0x15b   : > { %1078 = vmatmul.bf16.gmra.mxu1 %v5209_v6  ;;  %1523 = vmatmul.bf16.gmra.mxu2 %v5236_v17  ;;  %v5245_v27 = vadd.f32 %v2015_v32, %v1830_v55 }
 0x15c   : > { %1779 = vmatmul.bf16.gmra.mxu3 %v5239_v0 }
 0x15d   : > { %2057 = vmatmul.bf16.gmra.mxu0 %v5241_v58 }
 0x15e   : > { %v1484_v61 = vpop.f32.mrf.mxu2 }
 0x15f   : > { %v1575_v44 = vadd.f32 %v1484_v61, %v1130_v7  ;;  %v1740_v26 = vpop.f32.mrf.mxu3 }
 0x160   : > { %v1041_v31 = vpop.f32.mrf.mxu1 }
 0x161   : > { %v1831_v14 = vadd.f32 %v1740_v26, %v1575_v44  ;;  %v1131_v56 = vadd.f32 %v1041_v31, %v4901_v30 }
 0x162   : > { %v2020_v25 = vpop.f32.mrf.mxu0 }
 0x163   : > { %v5250_v22 = vadd.f32 %v2018_v40, %v1831_v14 }
 0x166   : > { %v1486_v13 = vpop.f32.mrf.mxu2 }
 0x167   : > { %v1576_v32 = vadd.f32 %v1486_v13, %v1131_v56  ;;  %v1742_v2 = vpop.f32.mrf.mxu3 }
 0x168   : > { %v1044_v60 = vpop.f32.mrf.mxu1 }
 0x169   : > { %v1832_v43 = vadd.f32 %v1742_v2, %v1576_v32  ;;  %v1132_v35 = vadd.f32 %v1044_v60, %v4726_v57  ;;  %v4274_v57 = vld [vmem:[%s4347_s30 + $0x24] sm:$0xff] }
 0x16a   : > { %v2023_v1 = vpop.f32.mrf.mxu0 }
 0x16b   : > { %2244 = vmatmul.bf16.vlgmr.msra.gmra.mxu1 %v4596_v49  ;;  %2500 = vmatmul.bf16.vlgmr.msra.gmra.mxu2 %v4273_v20  ;;  %v5255_v39 = vadd.f32 %v2020_v25, %v1832_v43 }
 0x16c   : > { %2778 = vmatmul.bf16.vlgmr.msra.gmra.mxu3 %v4599_v52 }
 0x16d   : > { %3040 = vmatmul.bf16.vlgmr.msra.gmra.mxu0 %v4628_v63 }
 0x16e   : > { %v1489_v30 = vpop.f32.mrf.mxu2 }
 0x16f   : > { %v1577_v53 = vadd.f32 %v1489_v30, %v1132_v35  ;;  %v1745_v46 = vpop.f32.mrf.mxu3 }
 0x170   : > { %v1046_v5 = vpop.f32.mrf.mxu1 }
 0x171   : > { %v1833_v55 = vadd.f32 %v1745_v46, %v1577_v53  ;;  %v1133_v49 = vadd.f32 %v1046_v5, %v4758_v62 }
 0x172   : > { %v2025_v40 = vpop.f32.mrf.mxu0 }
 0x173   : > { %v5260_v7 = vadd.f32 %v2023_v1, %v1833_v55 }
 0x176   : > { %v1491_v61 = vpop.f32.mrf.mxu2 }
 0x177   : > { %v1578_v44 = vadd.f32 %v1491_v61, %v1133_v49  ;;  %v1747_v26 = vpop.f32.mrf.mxu3 }
 0x178   : > { %v1049_v31 = vpop.f32.mrf.mxu1 }
 0x179   : > { %v1834_v52 = vadd.f32 %v1747_v26, %v1578_v44  ;;  %v1134_v56 = vadd.f32 %v1049_v31, %v4787_v54  ;;  %v4275_v54 = vld [vmem:[%s4347_s30 + $0x30] sm:$0xff] }
 0x17a   : > { %v2028_v14 = vpop.f32.mrf.mxu0 }
 0x17b   : > { %2249 = vmatmul.bf16.gmra.mxu1 %v4628_v63  ;;  %2505 = vmatmul.bf16.gmra.mxu2 %v4274_v57  ;;  %v5265_v25 = vadd.f32 %v2025_v40, %v1834_v52 }
 0x17c   : > { %2783 = vmatmul.bf16.gmra.mxu3 %v4630_v21 }
 0x17d   : > { %3045 = vmatmul.bf16.gmra.mxu0 %v4672_v38 }
 0x17e   : > { %v1494_v62 = vpop.f32.mrf.mxu2 }
 0x17f   : > { %v1579_v13 = vadd.f32 %v1494_v62, %v1134_v56  ;;  %v1750_v32 = vpop.f32.mrf.mxu3 }
 0x180   : > { %v1051_v2 = vpop.f32.mrf.mxu1 }
 0x181   : > { %v1835_v60 = vadd.f32 %v1750_v32, %v1579_v13  ;;  %v1135_v63 = vadd.f32 %v1051_v2, %v4810_v10  ;;  %v5868_v32 = vld [vmem:[#allocation5_spill] sm:$0xff]  ;;  %v5869_v2 = vld [vmem:[#allocation15_spill] sm:$0xff] }
 0x182   : > { %v2030_v43 = vpop.f32.mrf.mxu0 }
 0x183   : > { %v5270_v1 = vadd.f32 %v2028_v14, %v1835_v60 }
 0x186   : > { %v1496_v20 = vpop.f32.mrf.mxu2 }
 0x187   : > { %v1580_v35 = vadd.f32 %v1496_v20, %v1135_v63  ;;  %v1752_v30 = vpop.f32.mrf.mxu3 }
 0x188   : > { %v1054_v53 = vpop.f32.mrf.mxu1 }
 0x189   : > { %v1836_v21 = vadd.f32 %v1752_v30, %v1580_v35  ;;  %v1136_v55 = vadd.f32 %v1054_v53, %v4842_v24  ;;  %v4276_v24 = vld [vmem:[%s4347_s30 + $0x3c] sm:$0xff] }
 0x18a   : > { %v2033_v46 = vpop.f32.mrf.mxu0 }
 0x18b   : > { %2254 = vmatmul.bf16.gmra.mxu1 %v4672_v38  ;;  %2510 = vmatmul.bf16.gmra.mxu2 %v4275_v54  ;;  %v5275_v5 = vadd.f32 %v2030_v43, %v1836_v21 }
 0x18c   : > { %2788 = vmatmul.bf16.gmra.mxu3 %v4675_v4 }
 0x18d   : > { %3050 = vmatmul.bf16.gmra.mxu0 %v4704_v36 }
 0x18e   : > { %v1499_v10 = vpop.f32.mrf.mxu2 }
 0x18f   : > { %v1581_v40 = vadd.f32 %v1499_v10, %v1136_v55  ;;  %v1755_v49 = vpop.f32.mrf.mxu3 }
 0x190   : > { %v1056_v61 = vpop.f32.mrf.mxu1 }
 0x191   : > { %v1837_v44 = vadd.f32 %v1755_v49, %v1581_v40  ;;  %v1137_v38 = vadd.f32 %v1056_v61, %v4871_v48  ;;  %v4277_v49 = vld [vmem:[%s4347_s30 + $0x48] sm:$0xff] }
 0x192   : > { %v2035_v26 = vpop.f32.mrf.mxu0 }
 0x193   : > { %v5280_v31 = vadd.f32 %v2033_v46, %v1837_v44  ;;  %v5871_v44 = vld [vmem:[#allocation6_spill] sm:$0xff] }
 0x196   : > { %v1501_v52 = vpop.f32.mrf.mxu2 }
 0x197   : > { %v1582_v14 = vadd.f32 %v1501_v52, %v1137_v38  ;;  %v1757_v57 = vpop.f32.mrf.mxu3  ;;  %v5873_v38 = vld [vmem:[#allocation3_spill] sm:$0xff] }
 0x198   : > { %v1059_v56 = vpop.f32.mrf.mxu1 }
 0x199   : > { %v1838_v4 = vadd.f32 %v1757_v57, %v1582_v14  ;;  %v1138_v60 = vadd.f32 %v1059_v56, %v5869_v2 }
 0x19a   : > { %v2038_v62 = vpop.f32.mrf.mxu0 }
 0x19b   : > { %2259 = vmatmul.bf16.gmra.mxu1 %v4704_v36  ;;  %2515 = vmatmul.bf16.gmra.mxu2 %v4276_v24  ;;  %v5285_v13 = vadd.f32 %v2035_v26, %v1838_v4  ;;  %v5870_v36 = vld [vmem:[#allocation17_spill] sm:$0xff] }
 0x19c   : > { %2793 = vmatmul.bf16.gmra.mxu3 %v4709_v41  ;;  %v5872_v26 = vld [vmem:[#allocation9_spill] sm:$0xff] }
 0x19d   : > { %3055 = vmatmul.bf16.gmra.mxu0 %v5868_v32 }
 0x19e   : > { %v1504_v48 = vpop.f32.mrf.mxu2 }
 0x19f   : > { %v1583_v43 = vadd.f32 %v1504_v48, %v1138_v60  ;;  %v1760_v63 = vpop.f32.mrf.mxu3 }
 0x1a0   : > { %v1061_v20 = vpop.f32.mrf.mxu1 }
 0x1a1   : > { %v1839_v35 = vadd.f32 %v1760_v63, %v1583_v43  ;;  %v1139_v21 = vadd.f32 %v1061_v20, %v5870_v36  ;;  %v4278_v36 = vld [vmem:[%s4347_s30 + $0x54] sm:$0xff] }
 0x1a2   : > { %v2040_v30 = vpop.f32.mrf.mxu0 }
 0x1a3   : > { %v5290_v53 = vadd.f32 %v2038_v62, %v1839_v35 }
 0x1a6   : > { %v1506_v46 = vpop.f32.mrf.mxu2 }
 0x1a7   : > { %v1584_v54 = vadd.f32 %v1506_v46, %v1139_v21  ;;  %v1762_v55 = vpop.f32.mrf.mxu3  ;;  %v5875_v46 = vld [vmem:[#allocation10_spill] sm:$0xff] }
 0x1a8   : > { %v1064_v10 = vpop.f32.mrf.mxu1 }
 0x1a9   : > { %v1840_v41 = vadd.f32 %v1762_v55, %v1584_v54  ;;  %v1140_v52 = vadd.f32 %v1064_v10, %v5873_v38  ;;  %v5876_v54 = vld [vmem:[#allocation13_spill] sm:$0xff]  ;;  %v5877_v55 = vld [vmem:[#allocation7_spill] sm:$0xff] }
 0x1aa   : > { %v2043_v40 = vpop.f32.mrf.mxu0 }
 0x1ab   : > { %2264 = vmatmul.bf16.gmra.mxu1 %v5868_v32  ;;  %2520 = vmatmul.bf16.gmra.mxu2 %v4277_v49  ;;  %v5295_v61 = vadd.f32 %v2040_v30, %v1840_v41  ;;  %v5874_v32 = vld [vmem:[#allocation4_spill] sm:$0xff] }
 0x1ac   : > { %2798 = vmatmul.bf16.gmra.mxu3 %v5871_v44 }
 0x1ad   : > { %3060 = vmatmul.bf16.gmra.mxu0 %v5872_v26 }
 0x1ae   : > { %v1509_v14 = vpop.f32.mrf.mxu2 }
 0x1af   : > { %v1585_v57 = vadd.f32 %v1509_v14, %v1140_v52  ;;  %v1765_v56 = vpop.f32.mrf.mxu3 }
 0x1b0   : > { %v1066_v4 = vpop.f32.mrf.mxu1 }
 0x1b1   : > { %v1841_v62 = vadd.f32 %v1765_v56, %v1585_v57  ;;  %v1141_v60 = vadd.f32 %v1066_v4, %v5874_v32 }
 0x1b2   : > { %v2045_v24 = vpop.f32.mrf.mxu0 }
 0x1b3   : > { %v5300_v2 = vadd.f32 %v2043_v40, %v1841_v62 }
 0x1b6   : > { %v1511_v48 = vpop.f32.mrf.mxu2 }
 0x1b7   : > { %v1586_v43 = vadd.f32 %v1511_v48, %v1141_v60  ;;  %v1767_v63 = vpop.f32.mrf.mxu3  ;;  %v4279_v48 = vld [vmem:[%s4347_s30 + $0x60] sm:$0xff] }
 0x1b8   : > { %v1069_v20 = vpop.f32.mrf.mxu1 }
 0x1b9   : > { %v1842_v35 = vadd.f32 %v1767_v63, %v1586_v43  ;;  %v1142_v10 = vadd.f32 %v1069_v20, %v5877_v55  ;;  %v5879_v63 = vld [vmem:[#allocation14_spill] sm:$0xff]  ;;  %v5880_v20 = vld [vmem:[#allocation19_spill] sm:$0xff] }
 0x1ba   : > { %v2048_v30 = vpop.f32.mrf.mxu0 }
 0x1bb   : > { %2269 = vmatmul.bf16.gmra.mxu1 %v5872_v26  ;;  %2525 = vmatmul.bf16.gmra.mxu2 %v4278_v36  ;;  %v5305_v21 = vadd.f32 %v2045_v24, %v1842_v35  ;;  %v5878_v26 = vld [vmem:[#allocation8_spill] sm:$0xff]  ;;  %v5881_v35 = vld [vmem:[#allocation11_spill] sm:$0xff] }
 0x1bc   : > { %2803 = vmatmul.bf16.gmra.mxu3 %v5875_v46 }
 0x1bd   : > { %3065 = vmatmul.bf16.gmra.mxu0 %v5876_v54 }
 0x1be   : > { %v1514_v41 = vpop.f32.mrf.mxu2 }
 0x1bf   : > { %v1587_v40 = vadd.f32 %v1514_v41, %v1142_v10  ;;  %v1770_v49 = vpop.f32.mrf.mxu3 }
 0x1c0   : > { %v1071_v44 = vpop.f32.mrf.mxu1 }
 0x1c1   : > { %v1843_v38 = vadd.f32 %v1770_v49, %v1587_v40  ;;  %v1143_v57 = vadd.f32 %v1071_v44, %v5878_v26 }
 0x1c2   : > { %v2050_v52 = vpop.f32.mrf.mxu0 }
 0x1c3   : > { %v5310_v14 = vadd.f32 %v2048_v30, %v1843_v38 }
 0x1c6   : > { %v1516_v56 = vpop.f32.mrf.mxu2 }
 0x1c7   : > { %v1588_v4 = vadd.f32 %v1516_v56, %v1143_v57  ;;  %v1772_v62 = vpop.f32.mrf.mxu3 }
 0x1c8   : > { %v1074_v24 = vpop.f32.mrf.mxu1 }
 0x1c9   : > { %v1844_v32 = vadd.f32 %v1772_v62, %v1588_v4  ;;  %v1144_v30 = vadd.f32 %v1074_v24, %v5881_v35  ;;  %v4280_v62 = vld [vmem:[%s4347_s30 + $0x6c] sm:$0xff] }
 0x1ca   : > { %v2053_v60 = vpop.f32.mrf.mxu0 }
 0x1cb   : > { %2274 = vmatmul.bf16.gmra.mxu1 %v5876_v54  ;;  %2530 = vmatmul.bf16.gmra.mxu2 %v4279_v48  ;;  %v5315_v43 = vadd.f32 %v2050_v52, %v1844_v32  ;;  %v5882_v54 = vld [vmem:[#allocation12_spill] sm:$0xff]  ;;  %v5884_v48 = vld [vmem:[#allocation22_spill] sm:$0xff] }
 0x1cc   : > { %2808 = vmatmul.bf16.gmra.mxu3 %v5879_v63  ;;  %v5883_v32 = vld [vmem:[#allocation20_spill] sm:$0xff] }
 0x1cd   : > { %3070 = vmatmul.bf16.gmra.mxu0 %v5880_v20 }
 0x1ce   : > { %v1519_v36 = vpop.f32.mrf.mxu2 }
 0x1cf   : > { %v1589_v46 = vadd.f32 %v1519_v36, %v1144_v30  ;;  %v1775_v55 = vpop.f32.mrf.mxu3 }
 0x1d0   : > { %v1076_v10 = vpop.f32.mrf.mxu1 }
 0x1d1   : > { %v1845_v41 = vadd.f32 %v1775_v55, %v1589_v46  ;;  %v1145_v44 = vadd.f32 %v1076_v10, %v5882_v54  ;;  %v5887_v54 = vld [vmem:[#allocation18_spill] sm:$0xff] }
 0x1d2   : > { %v2055_v40 = vpop.f32.mrf.mxu0 }
 0x1d3   : > { %v5320_v49 = vadd.f32 %v2053_v60, %v1845_v41  ;;  %v5885_v60 = vld [vmem:[#allocation16_spill] sm:$0xff] }
 0x1d6   : > { %v1521_v38 = vpop.f32.mrf.mxu2 }
 0x1d7   : > { %v1590_v52 = vadd.f32 %v1521_v38, %v1145_v44  ;;  %v1777_v26 = vpop.f32.mrf.mxu3 }
 0x1d8   : > { %v1079_v57 = vpop.f32.mrf.mxu1 }
 0x1d9   : > { %v1846_v56 = vadd.f32 %v1777_v26, %v1590_v52  ;;  %v1146_v63 = vadd.f32 %v1079_v57, %v5885_v60  ;;  %v5889_v57 = vld [vmem:[#allocation24_spill] sm:$0xff] }
 0x1da   : > { %v2058_v4 = vpop.f32.mrf.mxu0 }
 0x1db   : > { %2279 = vmatmul.bf16.gmra.mxu1 %v5880_v20  ;;  %2535 = vmatmul.bf16.gmra.mxu2 %v4280_v62  ;;  %v5325_v24 = vadd.f32 %v2055_v40, %v1846_v56  ;;  %v5888_v56 = vld [vmem:[#allocation21_spill] sm:$0xff] }
 0x1dc   : > { %2813 = vmatmul.bf16.gmra.mxu3 %v5883_v32 }
 0x1dd   : > { %3075 = vmatmul.bf16.gmra.mxu0 %v5884_v48 }
 0x1de   : > { %v1524_v35 = vpop.f32.mrf.mxu2 }
 0x1df   : > { %v1591_v30 = vadd.f32 %v1524_v35, %v1146_v63  ;;  %v1780_v36 = vpop.f32.mrf.mxu3 }
 0x1e0   : > { %v1081_v46 = vpop.f32.mrf.mxu1 }
 0x1e1   : > { %v1847_v55 = vadd.f32 %v1780_v36, %v1591_v30  ;;  %v1147_v20 = vadd.f32 %v1081_v46, %v5887_v54  ;;  %v5891_v46 = vld [vmem:[#allocation23_spill] sm:$0xff] }
 0x1e2   : > { %v2060_v10 = vpop.f32.mrf.mxu0 }
 0x1e3   : > { %v5330_v41 = vadd.f32 %v2058_v4, %v1847_v55 }
 0x1e5   : > { %5886 = vst [vmem:[#allocation5_spill] sm:$0xff] %v5330_v41 }
 0x1e6   : > { %v1526_v44 = vpop.f32.mrf.mxu2 }
 0x1e7   : > { %v1592_v38 = vadd.f32 %v1526_v44, %v1147_v20  ;;  %v1782_v40 = vpop.f32.mrf.mxu3 }
 0x1e8   : > { %v2245_v52 = vpop.f32.mrf.mxu1 }
 0x1e9   : > { %v1848_v26 = vadd.f32 %v1782_v40, %v1592_v38  ;;  %v2357_v62 = vadd.f32 %v2245_v52, %v5888_v56  ;;  %v5892_v56 = vld [vmem:[#allocation27_spill] sm:$0xff] }
 0x1ea   : > { %v3041_v32 = vpop.f32.mrf.mxu0 }
 0x1eb   : > { %2284 = vmatmul.bf16.gmra.mxu1 %v5884_v48  ;;  %2540 = vmatmul.bf16.gmra.mxu2 %v5889_v57  ;;  %v5336_v60 = vadd.f32 %v2060_v10, %v1848_v26 }
 0x1ec   : > { %2818 = vmatmul.bf16.gmra.mxu3 %v4977_v50 }
 0x1ed   : > { %5890 = vst [vmem:[#allocation15_spill] sm:$0xff] %v5336_v60  ;;  %3080 = vmatmul.bf16.gmra.mxu0 %v5015_v11 }
 0x1ee   : > { %v2501_v4 = vpop.f32.mrf.mxu2 }
 0x1ef   : > { %v2613_v63 = vadd.f32 %v2501_v4, %v2357_v62  ;;  %v2779_v35 = vpop.f32.mrf.mxu3 }
 0x1f0   : > { %v2247_v30 = vpop.f32.mrf.mxu1 }
 0x1f1   : > { %v2891_v36 = vadd.f32 %v2779_v35, %v2613_v63  ;;  %v2358_v55 = vadd.f32 %v2247_v30, %v5891_v46  ;;  %v5893_v35 = vld [vmem:[#allocation25_spill] sm:$0xff] }
 0x1f2   : > { %v3043_v54 = vpop.f32.mrf.mxu0 }
 0x1f3   : > { %v5341_v20 = vadd.f32 %v3041_v32, %v2891_v36 }
 0x1f6   : > { %v2503_v44 = vpop.f32.mrf.mxu2 }
 0x1f7   : > { %v2614_v48 = vadd.f32 %v2503_v44, %v2358_v55  ;;  %v2781_v38 = vpop.f32.mrf.mxu3 }
 0x1f8   : > { %v2250_v40 = vpop.f32.mrf.mxu1 }
 0x1f9   : > { %v2892_v10 = vadd.f32 %v2781_v38, %v2614_v48  ;;  %v2359_v52 = vadd.f32 %v2250_v40, %v5010_v28  ;;  %v5895_v40 = vld [vmem:[#allocation29_spill] sm:$0xff] }
 0x1fa   : > { %v3046_v50 = vpop.f32.mrf.mxu0 }
 0x1fb   : > { %v5344_v26 = vadd.f32 %v3043_v54, %v2892_v10  ;;  %2289 = vmatmul.bf16.gmra.mxu1 %v5015_v11  ;;  %2545 = vmatmul.bf16.gmra.mxu2 %v5029_v47  ;;  %v5894_v47 = vld [vmem:[#allocation26_spill] sm:$0xff] }
 0x1fc   : > { %2823 = vmatmul.bf16.gmra.mxu3 %v5018_v3 }
 0x1fd   : > { %3085 = vmatmul.bf16.gmra.mxu0 %v5892_v56 }
 0x1fe   : > { %v2506_v62 = vpop.f32.mrf.mxu2 }
 0x1ff   : > { %v2615_v32 = vadd.f32 %v2506_v62, %v2359_v52  ;;  %v2784_v57 = vpop.f32.mrf.mxu3 }
 0x200   : > { %v2252_v4 = vpop.f32.mrf.mxu1 }
 0x201   : > { %v2893_v63 = vadd.f32 %v2784_v57, %v2615_v32  ;;  %v2360_v30 = vadd.f32 %v2252_v4, %v5893_v35  ;;  %v5896_v57 = vld [vmem:[#allocation28_spill] sm:$0xff] }
 0x202   : > { %v3048_v36 = vpop.f32.mrf.mxu0 }
 0x203   : > { %v5351_v28 = vadd.f32 %v3046_v50, %v2893_v63 }
 0x206   : > { %v2508_v46 = vpop.f32.mrf.mxu2 }
 0x207   : > { %v2616_v55 = vadd.f32 %v2508_v46, %v2360_v30  ;;  %v2786_v54 = vpop.f32.mrf.mxu3 }
 0x208   : > { %v2255_v11 = vpop.f32.mrf.mxu1 }
 0x209   : > { %v2894_v44 = vadd.f32 %v2786_v54, %v2616_v55  ;;  %v2361_v48 = vadd.f32 %v2255_v11, %v5894_v47  ;;  %v5897_v54 = vld [vmem:[#allocation30_spill] sm:$0xff]  ;;  %v5898_v47 = vld [vmem:[#allocation32_spill] sm:$0xff] }
 0x20a   : > { %v3051_v3 = vpop.f32.mrf.mxu0 }
 0x20b   : > { %v5354_v38 = vadd.f32 %v3048_v36, %v2894_v44  ;;  %2294 = vmatmul.bf16.gmra.mxu1 %v5892_v56  ;;  %2550 = vmatmul.bf16.gmra.mxu2 %v5895_v40 }
 0x20c   : > { %2828 = vmatmul.bf16.gmra.mxu3 %v5072_v12 }
 0x20d   : > { %3090 = vmatmul.bf16.gmra.mxu0 %v5111_v9 }
 0x20e   : > { %v2511_v10 = vpop.f32.mrf.mxu2 }
 0x20f   : > { %v2617_v52 = vadd.f32 %v2511_v10, %v2361_v48  ;;  %v2789_v50 = vpop.f32.mrf.mxu3 }
 0x210   : > { %v2257_v62 = vpop.f32.mrf.mxu1 }
 0x211   : > { %v2895_v32 = vadd.f32 %v2789_v50, %v2617_v52  ;;  %v2362_v4 = vadd.f32 %v2257_v62, %v5896_v57  ;;  %v5899_v50 = vld [vmem:[#allocation31_spill] sm:$0xff] }
 0x212   : > { %v3053_v63 = vpop.f32.mrf.mxu0 }
 0x213   : > { %v5361_v35 = vadd.f32 %v3051_v3, %v2895_v32 }
 0x216   : > { %v2513_v30 = vpop.f32.mrf.mxu2 }
 0x217   : > { %v2618_v36 = vadd.f32 %v2513_v30, %v2362_v4  ;;  %v2791_v46 = vpop.f32.mrf.mxu3 }
 0x218   : > { %v2260_v56 = vpop.f32.mrf.mxu1 }
 0x219   : > { %v2896_v55 = vadd.f32 %v2791_v46, %v2618_v36  ;;  %v2363_v11 = vadd.f32 %v2260_v56, %v5897_v54 }
 0x21a   : > { %v3056_v12 = vpop.f32.mrf.mxu0 }
 0x21b   : > { %v5364_v44 = vadd.f32 %v3053_v63, %v2896_v55  ;;  %2299 = vmatmul.bf16.gmra.mxu1 %v5111_v9  ;;  %2555 = vmatmul.bf16.gmra.mxu2 %v5898_v47 }
 0x21c   : > { %2833 = vmatmul.bf16.gmra.mxu3 %v5115_v34 }
 0x21d   : > { %3095 = vmatmul.bf16.gmra.mxu0 %v5165_v51 }
 0x21e   : > { %v2516_v48 = vpop.f32.mrf.mxu2 }
 0x21f   : > { %v2619_v3 = vadd.f32 %v2516_v48, %v2363_v11  ;;  %v2794_v40 = vpop.f32.mrf.mxu3  ;;  %v5900_v48 = vld [vmem:[#allocation33_spill] sm:$0xff] }
 0x220   : > { %v2262_v10 = vpop.f32.mrf.mxu1 }
 0x221   : > { %v2897_v52 = vadd.f32 %v2794_v40, %v2619_v3  ;;  %v2364_v62 = vadd.f32 %v2262_v10, %v5899_v50 }
 0x222   : > { %v3058_v32 = vpop.f32.mrf.mxu0 }
 0x223   : > { %v5371_v57 = vadd.f32 %v3056_v12, %v2897_v52 }
 0x226   : > { %v2518_v4 = vpop.f32.mrf.mxu2 }
 0x227   : > { %v2620_v63 = vadd.f32 %v2518_v4, %v2364_v62  ;;  %v2796_v30 = vpop.f32.mrf.mxu3 }
 0x228   : > { %v2265_v9 = vpop.f32.mrf.mxu1 }
 0x229   : > { %v2898_v36 = vadd.f32 %v2796_v30, %v2620_v63  ;;  %v2365_v46 = vadd.f32 %v2265_v9, %v5159_v33  ;;  %v5901_v63 = vld [vmem:[#allocation34_spill] sm:$0xff] }
 0x22a   : > { %v3061_v34 = vpop.f32.mrf.mxu0  ;;  %v3938_v30 = vrot.slane %v5901_v63, 9 }
 0x22b   : > { %v5374_v56 = vadd.f32 %v3058_v32, %v2898_v36  ;;  %2304 = vmatmul.bf16.gmra.mxu1 %v5165_v51  ;;  %2560 = vmatmul.bf16.gmra.mxu2 %v5177_v8  ;;  %v2162_v8 = vrot.slane %v5187_v45, 5  ;;  %v2165_v36 = vrot.slane %v5205_v42, 5  ;;  %v195_v45 = vld [vmem:[%s4347_s30 + $0xcc] sm:$0xf] }
 0x22c   : > { %2838 = vmatmul.bf16.gmra.mxu3 %v5168_v23 }
 0x22d   : > { %3100 = vmatmul.bf16.gmra.mxu0 %v5207_v15  ;;  %v2164_v9 = vrot.slane %v2162_v8, 4 }
 0x22e   : > { %v2521_v55 = vpop.f32.mrf.mxu2 }
 0x22f   : > { %v2621_v54 = vadd.f32 %v2521_v55, %v2365_v46  ;;  %v2799_v11 = vpop.f32.mrf.mxu3  ;;  %v196_v46 = vld [vmem:[%s4347_s30 + $0xd0] sm:$0xf] }
 0x230   : > { %v2267_v12 = vpop.f32.mrf.mxu1  ;;  %v2687_v42 = vshll.u32 %v196_v46, 16 }
 0x231   : > { %v2899_v47 = vadd.f32 %v2799_v11, %v2621_v54  ;;  %v2366_v3 = vadd.f32 %v2267_v12, %v5900_v48  ;;  %v2163_v54 = vsel %vm4530_vm5, %v3938_v30, %v2162_v8  ;;  %v2678_v11 = vshrl.u32 %v195_v45, 16 }
 0x232   : > { %v3063_v40 = vpop.f32.mrf.mxu0  ;;  %v2681_v12 = vshll.u32 %v195_v45, 16  ;;  %v2689_v8 = vrot.slane %v2687_v42, 5  ;;  %v4087_v42 = vrot.slane %v195_v45, 9 }
 0x233   : > { %v5381_v33 = vadd.f32 %v3061_v34, %v2899_v47  ;;  %v2691_v47 = vshrl.u32 %v196_v46, 16 }
 0x236   : > { %v2523_v10 = vpop.f32.mrf.mxu2 }
 0x237   : > { %v2622_v52 = vadd.f32 %v2523_v10, %v2366_v3  ;;  %v2801_v51 = vpop.f32.mrf.mxu3  ;;  %v2184_v10 = vunpack.c.l.b16 %v2163_v54 }
 0x238   : > { %v2270_v23 = vpop.f32.mrf.mxu1 }
 0x239   : > { %v2900_v50 = vadd.f32 %v2801_v51, %v2622_v52  ;;  %v2367_v62 = vadd.f32 %v2270_v23, %v5201_v16  ;;  %v2680_v51 = vrot.slane %v2678_v11, 4  ;;  %v2683_v23 = vrot.slane %v2681_v12, 5 }
 0x23a   : > { %v3066_v32 = vpop.f32.mrf.mxu0 }
 0x23b   : > { %v5385_v4 = vadd.f32 %v3063_v40, %v2900_v50  ;;  %2309 = vmatmul.bf16.gmra.mxu1 %v5207_v15  ;;  %2565 = vmatmul.bf16.gmra.mxu2 %v5218_v19  ;;  %v2166_v15 = vsel %vm4530_vm5, %v2164_v9, %v2165_v36  ;;  %v2693_v50 = vrot.slane %v2691_v47, 4  ;;  %v2684_v60 = vor.u32 %v2683_v23, %v2680_v51 }
 0x23c   : > { %2843 = vmatmul.bf16.gmra.mxu3 %v5209_v6  ;;  %v2185_v52 = vunpack.c.l.b16 %v2166_v15 }
 0x23d   : > { %3105 = vmatmul.bf16.gmra.mxu0 %v5236_v17  ;;  %v2694_v41 = vor.u32 %v2693_v50, %v2689_v8  ;;  %v2685_v15 = vrot.slane %v2684_v60, 4 }
 0x23e   : > { %v2526_v34 = vpop.f32.mrf.mxu2 }
 0x23f   : > { %v2623_v16 = vadd.f32 %v2526_v34, %v2367_v62  ;;  %v2804_v55 = vpop.f32.mrf.mxu3  ;;  %v197_v62 = vld [vmem:[%s4347_s30 + $0xd4] sm:$0x1]  ;;  %v2186_v34 = vpack.c.b16 %v2185_v52, %v2184_v10  ;;  %v2695_v11 = vrot.slane %v2694_v41, 4 }
 0x240   : > { %v2272_v19 = vpop.f32.mrf.mxu1 }
 0x241   : > { %v2901_v6 = vadd.f32 %v2804_v55, %v2623_v16  ;;  %v2368_v48 = vadd.f32 %v2272_v19, %v5215_v59  ;;  %v2697_v16 = vshll.u32 %v197_v62, 16  ;;  %v2958_v19 = vrot.slane %v196_v46, 5 }
 0x242   : > { %v3068_v3 = vpop.f32.mrf.mxu0  ;;  %v2690_v46 = vsel %vm4525_vm4, %v2685_v15, %v2689_v8 }
 0x243   : > { %v5400_v40 = vadd.f32 %v3066_v32, %v2901_v6  ;;  %v2699_v12 = vrot.slane %v2697_v16, 5  ;;  %v2960_v47 = vrot.slane %v2958_v19, 4  ;;  %v2961_v6 = vrot.slane %v197_v62, 5 }
 0x244   : > { %v2959_v41 = vsel %vm4530_vm5, %v4087_v42, %v2958_v19  ;;  %v2718_v51 = vunpack.c.l.b16 %v2690_v46 }
 0x245   : > { %v2962_v45 = vsel %vm4530_vm5, %v2960_v47, %v2961_v6  ;;  %v2980_v50 = vunpack.c.l.b16 %v2959_v41 }
 0x246   : > { %v2528_v63 = vpop.f32.mrf.mxu2  ;;  %v2981_v62 = vunpack.c.l.b16 %v2962_v45 }
 0x247   : > { %v2624_v30 = vadd.f32 %v2528_v63, %v2368_v48  ;;  %v2806_v9 = vpop.f32.mrf.mxu3 }
 0x248   : > { %v2275_v36 = vpop.f32.mrf.mxu1 }
 0x249   : > { %v2902_v55 = vadd.f32 %v2806_v9, %v2624_v30  ;;  %v2369_v59 = vadd.f32 %v2275_v36, %v5233_v18  ;;  %v4156_v30 = vld [vmem:[%s4347_s30 + $0xcc] sm:$0xff]  ;;  %s4138_s30 = sshll.u32 %s5905_s10, 8 }
 0x24a   : > { %v3071_v32 = vpop.f32.mrf.mxu0  ;;  %s5693_s8 = scalar_lea.vmem %s5811_s2, %s4138_s30 }
 0x24b   : > { %v5404_v54 = vadd.f32 %v3068_v3, %v2902_v55  ;;  %2314 = vmatmul.bf16.gmra.mxu1 %v5236_v17  ;;  %2570 = vmatmul.bf16.gmra.mxu2 %v5239_v0  ;;  %v2700_v17 = vsel %vm4525_vm4, %v2695_v11, %v2699_v12 }
 0x24c   : > { %2848 = vmatmul.bf16.gmra.mxu3 %v5241_v58  ;;  %v2719_v23 = vunpack.c.l.b16 %v2700_v17 }
 0x24d   : > { %3110 = vmatmul.bf16.gmra.mxu0 %v2186_v34 }
 0x24e   : > { %v2531_v48 = vpop.f32.mrf.mxu2  ;;  %v2720_v36 = vpack.c.b16 %v2719_v23, %v2718_v51 }
 0x24f   : > { %v2625_v10 = vadd.f32 %v2531_v48, %v2369_v59  ;;  %v2809_v18 = vpop.f32.mrf.mxu3 }
 0x250   : > { %v2277_v52 = vpop.f32.mrf.mxu1 }
 0x251   : > { %v2903_v0 = vadd.f32 %v2809_v18, %v2625_v10  ;;  %v2370_v58 = vadd.f32 %v2277_v52, %v5245_v27  ;;  %v2982_v27 = vpack.c.b16 %v2981_v62, %v2980_v50 }
 0x252   : > { %v3073_v60 = vpop.f32.mrf.mxu0 }
 0x253   : > { %v5418_v3 = vadd.f32 %v3071_v32, %v2903_v0 }
 0x256   : > { %v2533_v8 = vpop.f32.mrf.mxu2 }
 0x257   : > { %v2626_v63 = vadd.f32 %v2533_v8, %v2370_v58  ;;  %v2811_v29 = vpop.f32.mrf.mxu3 }
 0x258   : > { %v2280_v9 = vpop.f32.mrf.mxu1 }
 0x259   : > { %v2904_v16 = vadd.f32 %v2811_v29, %v2626_v63  ;;  %v2371_v55 = vadd.f32 %v2280_v9, %v5250_v22 }
 0x25a   : > { %v3076_v59 = vpop.f32.mrf.mxu0 }
 0x25b   : > { %v5422_v19 = vadd.f32 %v3073_v60, %v2904_v16  ;;  %2319 = vmatmul.bf16.gmra.mxu1 %v2186_v34  ;;  %2575 = vmatmul.bf16.gmra.mxu2 %v4156_v30 }
 0x25c   : > { %2853 = vmatmul.bf16.gmra.mxu3 %v2720_v36 }
 0x25d   : > { %3115 = vmatmul.bf16.gmra.mxu0 %v2982_v27 }
 0x25e   : > { %v2536_v37 = vpop.f32.mrf.mxu2 }
 0x25f   : > { %v2627_v32 = vadd.f32 %v2536_v37, %v2371_v55  ;;  %v2814_v15 = vpop.f32.mrf.mxu3 }
 0x260   : > { %v2282_v11 = vpop.f32.mrf.mxu1 }
 0x261   : > { %v2905_v12 = vadd.f32 %v2814_v15, %v2627_v32  ;;  %v2372_v42 = vadd.f32 %v2282_v11, %v5255_v39 }
 0x262   : > { %v3078_v47 = vpop.f32.mrf.mxu0 }
 0x263   : > { %v5425_v6 = vadd.f32 %v3076_v59, %v2905_v12 }
 0x266   : > { %v2538_v48 = vpop.f32.mrf.mxu2 }
 0x267   : > { %v2628_v10 = vadd.f32 %v2538_v48, %v2372_v42  ;;  %v2816_v22 = vpop.f32.mrf.mxu3 }
 0x268   : > { %v2285_v18 = vpop.f32.mrf.mxu1 }
 0x269   : > { %v2906_v52 = vadd.f32 %v2816_v22, %v2628_v10  ;;  %v2373_v34 = vadd.f32 %v2285_v18, %v5260_v7 }
 0x26a   : > { %v3081_v46 = vpop.f32.mrf.mxu0 }
 0x26b   : > { %v5428_v17 = vadd.f32 %v3078_v47, %v2906_v52 }
 0x26e   : > { %v2541_v0 = vpop.f32.mrf.mxu2 }
 0x26f   : > { %v2629_v58 = vadd.f32 %v2541_v0, %v2373_v34  ;;  %v2819_v60 = vpop.f32.mrf.mxu3 }
 0x270   : > { %v2287_v41 = vpop.f32.mrf.mxu1 }
 0x271   : > { %v2907_v45 = vadd.f32 %v2819_v60, %v2629_v58  ;;  %v2374_v39 = vadd.f32 %v2287_v41, %v5265_v25  ;;  %v3249_v41 = vadd.f32 %v5344_v26, %v5341_v20 }
 0x272   : > { %v3083_v51 = vpop.f32.mrf.mxu0 }
 0x273   : > { %v5431_v23 = vadd.f32 %v3081_v46, %v2907_v45 }
 0x276   : > { %v2543_v50 = vpop.f32.mrf.mxu2 }
 0x277   : > { %v2630_v62 = vadd.f32 %v2543_v50, %v2374_v39  ;;  %v2821_v8 = vpop.f32.mrf.mxu3 }
 0x278   : > { %v2290_v63 = vpop.f32.mrf.mxu1 }
 0x279   : > { %v2908_v29 = vadd.f32 %v2821_v8, %v2630_v62  ;;  %v2375_v7 = vadd.f32 %v2290_v63, %v5270_v1 }
 0x27a   : > { %v3086_v30 = vpop.f32.mrf.mxu0 }
 0x27b   : > { %v5434_v9 = vadd.f32 %v3083_v51, %v2908_v29 }
 0x27e   : > { %v2546_v36 = vpop.f32.mrf.mxu2 }
 0x27f   : > { %v2631_v27 = vadd.f32 %v2546_v36, %v2375_v7  ;;  %v2824_v16 = vpop.f32.mrf.mxu3 }
 0x280   : > { %v2292_v55 = vpop.f32.mrf.mxu1 }
 0x281   : > { %v2909_v59 = vadd.f32 %v2824_v16, %v2631_v27  ;;  %v2376_v25 = vadd.f32 %v2292_v55, %v5275_v5 }
 0x282   : > { %v3088_v37 = vpop.f32.mrf.mxu0 }
 0x283   : > { %v5437_v32 = vadd.f32 %v3086_v30, %v2909_v59 }
 0x286   : > { %v2548_v15 = vpop.f32.mrf.mxu2 }
 0x287   : > { %v2632_v11 = vadd.f32 %v2548_v15, %v2376_v25  ;;  %v2826_v12 = vpop.f32.mrf.mxu3 }
 0x288   : > { %v2295_v42 = vpop.f32.mrf.mxu1 }
 0x289   : > { %v2910_v47 = vadd.f32 %v2826_v12, %v2632_v11  ;;  %v2377_v1 = vadd.f32 %v2295_v42, %v5280_v31  ;;  %v3250_v31 = vadd.f32 %v3249_v41, %v5351_v28 }
 0x28a   : > { %v3091_v48 = vpop.f32.mrf.mxu0 }
 0x28b   : > { %v5440_v10 = vadd.f32 %v3088_v37, %v2910_v47  ;;  %v3251_v51 = vadd.f32 %v3250_v31, %v5354_v38 }
 0x28d   : > { %v3252_v50 = vadd.f32 %v3251_v51, %v5361_v35 }
 0x28e   : > { %v2551_v22 = vpop.f32.mrf.mxu2 }
 0x28f   : > { %v2633_v18 = vadd.f32 %v2551_v22, %v2377_v1  ;;  %v2829_v52 = vpop.f32.mrf.mxu3  ;;  %v3253_v63 = vadd.f32 %v3252_v50, %v5364_v44 }
 0x290   : > { %v2297_v34 = vpop.f32.mrf.mxu1 }
 0x291   : > { %v2911_v46 = vadd.f32 %v2829_v52, %v2633_v18  ;;  %v3254_v30 = vadd.f32 %v3253_v63, %v5371_v57  ;;  %v2378_v52 = vadd.f32 %v2297_v34, %v5285_v13 }
 0x292   : > { %v3093_v0 = vpop.f32.mrf.mxu0 }
 0x293   : > { %v5442_v5 = vadd.f32 %v3091_v48, %v2911_v46  ;;  %v3255_v36 = vadd.f32 %v3254_v30, %v5374_v56 }
 0x295   : > { %v3256_v27 = vadd.f32 %v3255_v36, %v5381_v33 }
 0x296   : > { %v2553_v58 = vpop.f32.mrf.mxu2 }
 0x297   : > { %v2831_v60 = vpop.f32.mrf.mxu3  ;;  %v3257_v59 = vadd.f32 %v3256_v27, %v5385_v4  ;;  %v2634_v41 = vadd.f32 %v2553_v58, %v2378_v52 }
 0x298   : > { %v2300_v45 = vpop.f32.mrf.mxu1 }
 0x299   : > { %v3258_v15 = vadd.f32 %v3257_v59, %v5400_v40  ;;  %v2379_v31 = vadd.f32 %v2300_v45, %v5290_v53 }
 0x29a   : > { %v3096_v39 = vpop.f32.mrf.mxu0 }
 0x29b   : > { %v3259_v11 = vadd.f32 %v3258_v15, %v5404_v54  ;;  %v2912_v15 = vadd.f32 %v2831_v60, %v2634_v41 }
 0x29d   : > { %v3260_v12 = vadd.f32 %v3259_v11, %v5418_v3 }
 0x29e   : > { %v2556_v62 = vpop.f32.mrf.mxu2 }
 0x29f   : > { %v2834_v8 = vpop.f32.mrf.mxu3  ;;  %v3261_v1 = vadd.f32 %v3260_v12, %v5422_v19  ;;  %v2635_v63 = vadd.f32 %v2556_v62, %v2379_v31  ;;  %v5469_v62 = vadd.f32 %v3093_v0, %v2912_v15 }
 0x2a0   : > { %v2302_v29 = vpop.f32.mrf.mxu1 }
 0x2a1   : > { %v3262_v18 = vadd.f32 %v3261_v1, %v5425_v6  ;;  %v2380_v30 = vadd.f32 %v2302_v29, %v5295_v61  ;;  %v2913_v58 = vadd.f32 %v2834_v8, %v2635_v63 }
 0x2a2   : > { %v3098_v7 = vpop.f32.mrf.mxu0 }
 0x2a3   : > { %v3263_v46 = vadd.f32 %v3262_v18, %v5428_v17 }
 0x2a5   : > { %v3264_v51 = vadd.f32 %v3263_v46, %v5431_v23 }
 0x2a6   : > { %v2558_v16 = vpop.f32.mrf.mxu2 }
 0x2a7   : > { %v2836_v55 = vpop.f32.mrf.mxu3  ;;  %v3265_v27 = vadd.f32 %v3264_v51, %v5434_v9  ;;  %v2636_v11 = vadd.f32 %v2558_v16, %v2380_v30  ;;  %v5473_v16 = vadd.f32 %v3096_v39, %v2913_v58 }
 0x2a8   : > { %v2305_v25 = vpop.f32.mrf.mxu1 }
 0x2a9   : > { %v2381_v12 = vadd.f32 %v2305_v25, %v5300_v2  ;;  %v3266_v34 = vadd.f32 %v3265_v27, %v5437_v32  ;;  %v2914_v61 = vadd.f32 %v2836_v55, %v2636_v11 }
 0x2aa   : > { %v3101_v37 = vpop.f32.mrf.mxu0 }
 0x2ab   : > { %v3267_v45 = vadd.f32 %v3266_v34, %v5440_v10 }
 0x2ad   : > { %v3268_v60 = vadd.f32 %v3267_v45, %v5442_v5 }
 0x2ae   : > { %v2561_v42 = vpop.f32.mrf.mxu2 }
 0x2af   : > { %v2839_v47 = vpop.f32.mrf.mxu3  ;;  %v2637_v1 = vadd.f32 %v2561_v42, %v2381_v12  ;;  %v3269_v42 = vadd.f32 %v3268_v60, %v5469_v62 }
 0x2b0   : > { %v2307_v48 = vpop.f32.mrf.mxu1 }
 0x2b1   : > { %v2382_v53 = vadd.f32 %v2307_v48, %v5305_v21  ;;  %v2915_v2 = vadd.f32 %v2839_v47, %v2637_v1  ;;  %v5476_v21 = vadd.f32 %v3098_v7, %v2914_v61  ;;  %v3270_v55 = vadd.f32 %v3269_v42, %v5473_v16  ;;  %v5902_v42 = vld [vmem:[#allocation5_spill] sm:$0xff] }
 0x2b2   : > { %v3103_v22 = vpop.f32.mrf.mxu0 }
 0x2b3   : > { %v5479_v41 = vadd.f32 %v3101_v37, %v2915_v2  ;;  %v3271_v31 = vadd.f32 %v3270_v55, %v5476_v21 }
 0x2b6   : > { %v2563_v50 = vpop.f32.mrf.mxu2 }
 0x2b7   : > { %v2841_v36 = vpop.f32.mrf.mxu3  ;;  %v2638_v29 = vadd.f32 %v2563_v50, %v2382_v53  ;;  %v3272_v50 = vadd.f32 %v3271_v31, %v5479_v41 }
 0x2b8   : > { %v2310_v59 = vpop.f32.mrf.mxu1 }
 0x2b9   : > { %v2383_v18 = vadd.f32 %v2310_v59, %v5310_v14  ;;  %v2916_v48 = vadd.f32 %v2841_v36, %v2638_v29 }
 0x2ba   : > { %v3106_v13 = vpop.f32.mrf.mxu0 }
 0x2bb   : > { %v5482_v51 = vadd.f32 %v3103_v22, %v2916_v48 }
 0x2bd   : > { %v3273_v36 = vadd.f32 %v3272_v50, %v5482_v51  ;;  %v4289_v50 = vmov 256.0  }
 0x2be   : > { %v2566_v52 = vpop.f32.mrf.mxu2  ;;  %4263 = vrcp.f32 %v4289_v50 }
 0x2bf   : > { %v2639_v25 = vadd.f32 %v2566_v52, %v2383_v18  ;;  %v2844_v46 = vpop.f32.mrf.mxu3 }
 0x2c0   : > { %v2312_v8 = vpop.f32.mrf.mxu1 }
 0x2c1   : > { %v2917_v14 = vadd.f32 %v2844_v46, %v2639_v25  ;;  %v2384_v39 = vadd.f32 %v2312_v8, %v5315_v43 }
 0x2c2   : > { %v3108_v0 = vpop.f32.mrf.mxu0 }
 0x2c3   : > { %v3179_v63 = vadd.f32 %v3106_v13, %v2917_v14 }
 0x2c5   : > { %v3274_v15 = vadd.f32 %v3273_v36, %v3179_v63 }
 0x2c6   : > { %v2568_v47 = vpop.f32.mrf.mxu2 }
 0x2c7   : > { %v2640_v30 = vadd.f32 %v2568_v47, %v2384_v39  ;;  %v2846_v7 = vpop.f32.mrf.mxu3 }
 0x2c8   : > { %v2315_v27 = vpop.f32.mrf.mxu1 }
 0x2c9   : > { %v2918_v59 = vadd.f32 %v2846_v7, %v2640_v30  ;;  %v2385_v34 = vadd.f32 %v2315_v27, %v5320_v49  ;;  %v5903_v30 = vld [vmem:[#allocation15_spill] sm:$0xff] }
 0x2ca   : > { %v3111_v11 = vpop.f32.mrf.mxu0 }
 0x2cb   : > { %v3180_v37 = vadd.f32 %v3108_v0, %v2918_v59 }
 0x2cd   : > { %v3275_v12 = vadd.f32 %v3274_v15, %v3180_v37  ;;  %v4264_v15 = vpop.eup %4263 }
 0x2ce   : > { %v2571_v22 = vpop.f32.mrf.mxu2  ;;  %vm3291_vm6 = vweird.f32 %v4264_v15 }
 0x2cf   : > { %v2641_v58 = vadd.f32 %v2571_v22, %v2385_v34  ;;  %v2849_v1 = vpop.f32.mrf.mxu3  ;;  %v3287_v22 = vmul.f32 256.0, %v4264_v15 }
 0x2d0   : > { %v2317_v43 = vpop.f32.mrf.mxu1 }
 0x2d1   : > { %v2919_v53 = vadd.f32 %v2849_v1, %v2641_v58  ;;  %v2386_v13 = vadd.f32 %v2317_v43, %v5325_v24  ;;  %v3288_v43 = vsub.f32 1.0, %v3287_v22 }
 0x2d2   : > { %v3113_v29 = vpop.f32.mrf.mxu0 }
 0x2d3   : > { %v3181_v45 = vadd.f32 %v3111_v11, %v2919_v53 }
 0x2d5   : > { %v3276_v61 = vadd.f32 %v3275_v12, %v3181_v45 }
 0x2d6   : > { %v2573_v18 = vpop.f32.mrf.mxu2 }
 0x2d7   : > { %v2642_v52 = vadd.f32 %v2573_v18, %v2386_v13  ;;  %v2851_v60 = vpop.f32.mrf.mxu3  ;;  %v3289_v13 = vmul.f32 %v4264_v15, %v3288_v43 }
 0x2d8   : > { %v2320_v2 = vpop.f32.mrf.mxu1 }
 0x2d9   : > { %v2920_v25 = vadd.f32 %v2851_v60, %v2642_v52  ;;  %v2387_v48 = vadd.f32 %v2320_v2, %v5902_v42  ;;  %v3290_v52 = vadd.f32 %v4264_v15, %v3289_v13 }
 0x2da   : > { %v3116_v14 = vpop.f32.mrf.mxu0 }
 0x2db   : > { %v3182_v46 = vadd.f32 %v3113_v29, %v2920_v25  ;;  %v5491_v2 = vsel %vm3291_vm6, %v4264_v15, %v3290_v52 }
 0x2dd   : > { %v3277_v8 = vadd.f32 %v3276_v61, %v3182_v46 }
 0x2de   : > { %v2576_v49 = vpop.f32.mrf.mxu2 }
 0x2df   : > { %v2643_v0 = vadd.f32 %v2576_v49, %v2387_v48  ;;  %v2854_v55 = vpop.f32.mrf.mxu3 }
 0x2e0   : > { %v2322_v39 = vpop.f32.mrf.mxu1 }
 0x2e1   : > { %v2921_v31 = vadd.f32 %v2854_v55, %v2643_v0  ;;  %v2388_v7 = vadd.f32 %v2322_v39, %v5903_v30 }
 0x2e2   : > { %v3118_v12 = vpop.f32.mrf.mxu0 }
 0x2e3   : > { %v3183_v47 = vadd.f32 %v3116_v14, %v2921_v31 }
 0x2e5   : > { %v3278_v24 = vadd.f32 %v3277_v8, %v3183_v47 }
 0x2e6   : > { %v2578_v27 = vpop.f32.mrf.mxu2 }
 0x2e7   : > { %v2644_v36 = vadd.f32 %v2578_v27, %v2388_v7  ;;  %v2856_v59 = vpop.f32.mrf.mxu3 }
 0x2e9   : > { %v2922_v11 = vadd.f32 %v2856_v59, %v2644_v36 }
 0x2eb   : > { %v3184_v34 = vadd.f32 %v3118_v12, %v2922_v11 }
 0x2ed   : > { %v3279_v58 = vadd.f32 %v3278_v24, %v3184_v34 }
 0x2ef   : > { %v3280_v1 = vrot.slane %v3279_v58, 4 }
 0x2f1   : > { %v3281_v53 = vadd.f32 %v3280_v1, %v3279_v58 }
 0x2f3   : > { %v3282_v61 = vrot.slane %v3281_v53, 2 }
 0x2f5   : > { %v3283_v29 = vadd.f32 %v3282_v61, %v3281_v53 }
 0x2f7   : > { %v3284_v18 = vrot.slane %v3283_v29, 1 }
 0x2f9   : > { %v3285_v60 = vadd.f32 %v3284_v18, %v3283_v29 }
 0x2fb   : > { %v5494_v25 = vmul.f32 %v5491_v2, %v3285_v60 }
 0x2fd   : > { %v5497_v8 = vsub.f32 %v3179_v63, %v5494_v25  ;;  %v5500_v42 = vsub.f32 %v3180_v37, %v5494_v25  ;;  %v5503_v48 = vsub.f32 %v3181_v45, %v5494_v25  ;;  %v5506_v49 = vsub.f32 %v3182_v46, %v5494_v25 }
 0x2fe   : > { %v5509_v0 = vsub.f32 %v3183_v47, %v5494_v25  ;;  %v5512_v55 = vsub.f32 %v3184_v34, %v5494_v25  ;;  %v5516_v14 = vsub.f32 %v5341_v20, %v5494_v25  ;;  %v5520_v63 = vsub.f32 %v5344_v26, %v5494_v25 }
 0x2ff   : > { %v5524_v37 = vsub.f32 %v5351_v28, %v5494_v25  ;;  %v5532_v31 = vsub.f32 %v5354_v38, %v5494_v25  ;;  %v5536_v20 = vsub.f32 %v5361_v35, %v5494_v25  ;;  %v5542_v28 = vsub.f32 %v5364_v44, %v5494_v25 }
 0x300   : > { %v3326_v45 = vmul.f32 %v5516_v14, %v5516_v14  ;;  %v3327_v46 = vmul.f32 %v5520_v63, %v5520_v63  ;;  %v5548_v38 = vsub.f32 %v5371_v57, %v5494_v25  ;;  %v5554_v30 = vsub.f32 %v5374_v56, %v5494_v25 }
 0x301   : > { %v3328_v26 = vmul.f32 %v5524_v37, %v5524_v37  ;;  %v3329_v47 = vmul.f32 %v5532_v31, %v5532_v31  ;;  %v3330_v35 = vmul.f32 %v5536_v20, %v5536_v20  ;;  %v3331_v44 = vmul.f32 %v5542_v28, %v5542_v28 }
 0x302   : > { %v3358_v39 = vadd.f32 %v3327_v46, %v3326_v45  ;;  %v5560_v27 = vsub.f32 %v5381_v33, %v5494_v25  ;;  %v3332_v57 = vmul.f32 %v5548_v38, %v5548_v38  ;;  %v5566_v59 = vsub.f32 %v5385_v4, %v5494_v25 }
 0x303   : > { %v3333_v56 = vmul.f32 %v5554_v30, %v5554_v30  ;;  %v5572_v11 = vsub.f32 %v5400_v40, %v5494_v25  ;;  %v5578_v34 = vsub.f32 %v5404_v54, %v5494_v25  ;;  %v5584_v58 = vsub.f32 %v5418_v3, %v5494_v25 }
 0x304   : > { %v3359_v50 = vadd.f32 %v3358_v39, %v3328_v26  ;;  %v3334_v33 = vmul.f32 %v5560_v27, %v5560_v27  ;;  %v3335_v4 = vmul.f32 %v5566_v59, %v5566_v59  ;;  %v5590_v43 = vsub.f32 %v5422_v19, %v5494_v25 }
 0x305   : > { %v3336_v40 = vmul.f32 %v5572_v11, %v5572_v11  ;;  %v3337_v54 = vmul.f32 %v5578_v34, %v5578_v34  ;;  %v5596_v61 = vsub.f32 %v5425_v6, %v5494_v25  ;;  %v3338_v3 = vmul.f32 %v5584_v58, %v5584_v58 }
 0x306   : > { %v3360_v24 = vadd.f32 %v3359_v50, %v3329_v47  ;;  %v5602_v29 = vsub.f32 %v5428_v17, %v5494_v25  ;;  %v3339_v19 = vmul.f32 %v5590_v43, %v5590_v43  ;;  %v5608_v52 = vsub.f32 %v5431_v23, %v5494_v25 }
 0x307   : > { %v3340_v6 = vmul.f32 %v5596_v61, %v5596_v61  ;;  %v5614_v45 = vsub.f32 %v5434_v9, %v5494_v25  ;;  %v5620_v26 = vsub.f32 %v5437_v32, %v5494_v25  ;;  %v5626_v47 = vsub.f32 %v5440_v10, %v5494_v25 }
 0x308   : > { %v3361_v7 = vadd.f32 %v3360_v24, %v3330_v35  ;;  %v3341_v17 = vmul.f32 %v5602_v29, %v5602_v29  ;;  %v3342_v23 = vmul.f32 %v5608_v52, %v5608_v52  ;;  %v5632_v35 = vsub.f32 %v5442_v5, %v5494_v25 }
 0x309   : > { %v3343_v9 = vmul.f32 %v5614_v45, %v5614_v45  ;;  %v3344_v32 = vmul.f32 %v5620_v26, %v5620_v26  ;;  %v3345_v10 = vmul.f32 %v5626_v47, %v5626_v47 }
 0x30a   : > { %v3362_v36 = vadd.f32 %v3361_v7, %v3331_v44  ;;  %v5638_v44 = vsub.f32 %v5469_v62, %v5494_v25  ;;  %v3346_v5 = vmul.f32 %v5632_v35, %v5632_v35 }
 0x30c   : > { %v3363_v15 = vadd.f32 %v3362_v36, %v3332_v57  ;;  %v5644_v57 = vsub.f32 %v5473_v16, %v5494_v25  ;;  %v3347_v62 = vmul.f32 %v5638_v44, %v5638_v44 }
 0x30e   : > { %v3364_v12 = vadd.f32 %v3363_v15, %v3333_v56  ;;  %v5650_v56 = vsub.f32 %v5476_v21, %v5494_v25  ;;  %v3348_v16 = vmul.f32 %v5644_v57, %v5644_v57 }
 0x310   : > { %v3365_v22 = vadd.f32 %v3364_v12, %v3334_v33  ;;  %v5656_v33 = vsub.f32 %v5479_v41, %v5494_v25  ;;  %v3349_v21 = vmul.f32 %v5650_v56, %v5650_v56 }
 0x312   : > { %v3366_v1 = vadd.f32 %v3365_v22, %v3335_v4  ;;  %v5662_v4 = vsub.f32 %v5482_v51, %v5494_v25  ;;  %v3353_v51 = vmul.f32 %v5500_v42, %v5500_v42 }
 0x314   : > { %v3367_v53 = vadd.f32 %v3366_v1, %v3336_v40  ;;  %v3350_v40 = vmul.f32 %v5656_v33, %v5656_v33  ;;  %v3351_v41 = vmul.f32 %v5662_v4, %v5662_v4 }
 0x316   : > { %v3368_v13 = vadd.f32 %v3367_v53, %v3337_v54  ;;  %v3352_v53 = vmul.f32 %v5497_v8, %v5497_v8 }
 0x318   : > { %v3369_v18 = vadd.f32 %v3368_v13, %v3338_v3  ;;  %v3354_v13 = vmul.f32 %v5503_v48, %v5503_v48 }
 0x31a   : > { %v3370_v60 = vadd.f32 %v3369_v18, %v3339_v19  ;;  %v3355_v18 = vmul.f32 %v5506_v49, %v5506_v49 }
 0x31c   : > { %v3371_v46 = vadd.f32 %v3370_v60, %v3340_v6  ;;  %v3356_v60 = vmul.f32 %v5509_v0, %v5509_v0 }
 0x31e   : > { %v3372_v39 = vadd.f32 %v3371_v46, %v3341_v17  ;;  %v3357_v46 = vmul.f32 %v5512_v55, %v5512_v55 }
 0x320   : > { %v3373_v50 = vadd.f32 %v3372_v39, %v3342_v23 }
 0x322   : > { %v3374_v24 = vadd.f32 %v3373_v50, %v3343_v9 }
 0x324   : > { %v3375_v7 = vadd.f32 %v3374_v24, %v3344_v32 }
 0x326   : > { %v3376_v36 = vadd.f32 %v3375_v7, %v3345_v10 }
 0x328   : > { %v3377_v15 = vadd.f32 %v3376_v36, %v3346_v5 }
 0x32a   : > { %v3378_v12 = vadd.f32 %v3377_v15, %v3347_v62 }
 0x32c   : > { %v3379_v22 = vadd.f32 %v3378_v12, %v3348_v16 }
 0x32e   : > { %v3380_v1 = vadd.f32 %v3379_v22, %v3349_v21 }
 0x330   : > { %v3381_v54 = vadd.f32 %v3380_v1, %v3350_v40 }
 0x332   : > { %v3382_v3 = vadd.f32 %v3381_v54, %v3351_v41 }
 0x334   : > { %v3383_v25 = vadd.f32 %v3382_v3, %v3352_v53 }
 0x336   : > { %v3384_v19 = vadd.f32 %v3383_v25, %v3353_v51 }
 0x338   : > { %v3385_v6 = vadd.f32 %v3384_v19, %v3354_v13 }
 0x33a   : > { %v3386_v17 = vadd.f32 %v3385_v6, %v3355_v18 }
 0x33c   : > { %v3387_v23 = vadd.f32 %v3386_v17, %v3356_v60 }
 0x33e   : > { %v3388_v39 = vadd.f32 %v3387_v23, %v3357_v46 }
 0x340   : > { %v3389_v9 = vrot.slane %v3388_v39, 4 }
 0x342   : > { %v3390_v50 = vadd.f32 %v3389_v9, %v3388_v39 }
 0x344   : > { %v3391_v32 = vrot.slane %v3390_v50, 2 }
 0x346   : > { %v3392_v24 = vadd.f32 %v3391_v32, %v3390_v50 }
 0x348   : > { %v3393_v10 = vrot.slane %v3392_v24, 1 }
 0x34a   : > { %v3394_v7 = vadd.f32 %v3393_v10, %v3392_v24 }
 0x34c   : > { %v3395_v5 = vmul.f32 %v3394_v7, %v5491_v2 }
 0x34e   : > { %v3396_v36 = vadd.f32 1e-05, %v3395_v5 }
 0x350   : > { %4265 = vrsqrt.f32 %v3396_v36  ;;  %vm3403_vm8 = vweird.f32 %v3396_v36 }
 0x356   : > { %v4266_v62 = vpop.eup %4265 }
 0x357   : > { %v3398_v15 = vmul.f32 %v4266_v62, %v3396_v36  ;;  %vm3404_vm7 = vweird.f32 %v4266_v62 }
 0x358   : > { %vm3405_vm9 = vmor %vm3403_vm8, %vm3404_vm7 }
 0x359   : > { %v3399_v16 = vmul.f32 %v4266_v62, %v3398_v15 }
 0x35b   : > { %v3400_v12 = vmul.f32 0.5, %v3399_v16 }
 0x35d   : > { %v3401_v21 = vsub.f32 1.5, %v3400_v12 }
 0x35f   : > { %v3402_v22 = vmul.f32 %v4266_v62, %v3401_v21 }
 0x361   : > { %v5683_v40 = vsel %vm3405_vm9, %v4266_v62, %v3402_v22 }
 0x362   : > { %v3407_v1 = vmul.f32 %v5683_v40, %v5516_v14  ;;  %v3408_v2 = vmul.f32 %v5683_v40, %v5520_v63  ;;  %v3409_v41 = vmul.f32 %v5683_v40, %v5524_v37  ;;  %v3410_v53 = vmul.f32 %v5683_v40, %v5532_v31 }
 0x363   : > { %v3411_v14 = vmul.f32 %v5683_v40, %v5536_v20  ;;  %v3412_v63 = vmul.f32 %v5683_v40, %v5542_v28  ;;  %v3413_v25 = vmul.f32 %v5683_v40, %v5548_v38  ;;  %v3414_v37 = vmul.f32 %v5683_v40, %v5554_v30 }
 0x364   : > { %vm3439_vm10 = vcmp.ge.f32.partialorder %v3407_v1, 0.0  ;;  %v3471_v54 = vmul.f32 0.2, %v3407_v1  ;;  %v3472_v51 = vmul.f32 0.2, %v3408_v2  ;;  %vm3440_vm11 = vcmp.ge.f32.partialorder %v3408_v2, 0.0 }
 0x365   : > { %v3473_v13 = vmul.f32 0.2, %v3409_v41  ;;  %vm3441_vm12 = vcmp.ge.f32.partialorder %v3409_v41, 0.0  ;;  %v3474_v19 = vmul.f32 0.2, %v3410_v53  ;;  %v3415_v31 = vmul.f32 %v5683_v40, %v5560_v27 }
 0x366   : > { %v3503_v3 = vsel %vm3439_vm10, %v3407_v1, %v3471_v54  ;;  %vm3442_vm13 = vcmp.ge.f32.partialorder %v3410_v53, 0.0  ;;  %v3475_v20 = vmul.f32 0.2, %v3411_v14  ;;  %v3416_v28 = vmul.f32 %v5683_v40, %v5566_v59 }
 0x367   : > { %3535 = vst [vmem:[%s5693_s8] sm:$0xff] %v3503_v3  ;;  %vm3443_vm14 = vcmp.ge.f32.partialorder %v3411_v14, 0.0  ;;  %v3476_v18 = vmul.f32 0.2, %v3412_v63  ;;  %v3504_v6 = vsel %vm3440_vm11, %v3408_v2, %v3472_v51  ;;  %v3417_v38 = vmul.f32 %v5683_v40, %v5572_v11 }
 0x368   : > { %vm3444_vm15 = vcmp.ge.f32.partialorder %v3412_v63, 0.0  ;;  %v3477_v30 = vmul.f32 0.2, %v3413_v25  ;;  %v3505_v60 = vsel %vm3441_vm12, %v3409_v41, %v3473_v13  ;;  %v3418_v17 = vmul.f32 %v5683_v40, %v5578_v34  ;;  %3536 = vst [vmem:[%s5693_s8 + $0x8] sm:$0xff] %v3504_v6 }
 0x369   : > { %vm3445_vm0 = vcmp.ge.f32.partialorder %v3413_v25, 0.0  ;;  %v3478_v27 = vmul.f32 0.2, %v3414_v37  ;;  %v3506_v46 = vsel %vm3442_vm13, %v3410_v53, %v3474_v19  ;;  %v3419_v59 = vmul.f32 %v5683_v40, %v5584_v58  ;;  %3537 = vst [vmem:[%s5693_s8 + $0x10] sm:$0xff] %v3505_v60 }
 0x36a   : > { %vm3446_vm1 = vcmp.ge.f32.partialorder %v3414_v37, 0.0  ;;  %v3479_v23 = vmul.f32 0.2, %v3415_v31  ;;  %v3507_v39 = vsel %vm3443_vm14, %v3411_v14, %v3475_v20  ;;  %v3420_v11 = vmul.f32 %v5683_v40, %v5590_v43  ;;  %3538 = vst [vmem:[%s5693_s8 + $0x18] sm:$0xff] %v3506_v46 }
 0x36b   : > { %vm3447_vm2 = vcmp.ge.f32.partialorder %v3415_v31, 0.0  ;;  %v3480_v9 = vmul.f32 0.2, %v3416_v28  ;;  %v3508_v50 = vsel %vm3444_vm15, %v3412_v63, %v3476_v18  ;;  %v3421_v34 = vmul.f32 %v5683_v40, %v5596_v61  ;;  %3539 = vst [vmem:[%s5693_s8 + $0x20] sm:$0xff] %v3507_v39 }
 0x36c   : > { %vm3448_vm3 = vcmp.ge.f32.partialorder %v3416_v28, 0.0  ;;  %v3481_v32 = vmul.f32 0.2, %v3417_v38  ;;  %v3509_v58 = vsel %vm3445_vm0, %v3413_v25, %v3477_v30  ;;  %v3422_v24 = vmul.f32 %v5683_v40, %v5602_v29  ;;  %3540 = vst [vmem:[%s5693_s8 + $0x28] sm:$0xff] %v3508_v50 }
 0x36d   : > { %vm3449_vm4 = vcmp.ge.f32.partialorder %v3417_v38, 0.0  ;;  %v3482_v10 = vmul.f32 0.2, %v3418_v17  ;;  %v3510_v43 = vsel %vm3446_vm1, %v3414_v37, %v3478_v27  ;;  %v3423_v7 = vmul.f32 %v5683_v40, %v5608_v52  ;;  %3541 = vst [vmem:[%s5693_s8 + $0x30] sm:$0xff] %v3509_v58 }
 0x36e   : > { %vm3450_vm5 = vcmp.ge.f32.partialorder %v3418_v17, 0.0  ;;  %v3483_v61 = vmul.f32 0.2, %v3419_v59  ;;  %v3511_v5 = vsel %vm3447_vm2, %v3415_v31, %v3479_v23  ;;  %v3424_v36 = vmul.f32 %v5683_v40, %v5614_v45  ;;  %3542 = vst [vmem:[%s5693_s8 + $0x38] sm:$0xff] %v3510_v43 }
 0x36f   : > { %vm3451_vm6 = vcmp.ge.f32.partialorder %v3419_v59, 0.0  ;;  %v3484_v29 = vmul.f32 0.2, %v3420_v11  ;;  %v3512_v62 = vsel %vm3448_vm3, %v3416_v28, %v3480_v9  ;;  %v3425_v15 = vmul.f32 %v5683_v40, %v5620_v26  ;;  %3543 = vst [vmem:[%s5693_s8 + $0x40] sm:$0xff] %v3511_v5 }
 0x370   : > { %vm3452_vm7 = vcmp.ge.f32.partialorder %v3420_v11, 0.0  ;;  %v3485_v52 = vmul.f32 0.2, %v3421_v34  ;;  %v3513_v16 = vsel %vm3449_vm4, %v3417_v38, %v3481_v32  ;;  %v3426_v12 = vmul.f32 %v5683_v40, %v5626_v47  ;;  %3544 = vst [vmem:[%s5693_s8 + $0x48] sm:$0xff] %v3512_v62 }
 0x371   : > { %vm3453_vm8 = vcmp.ge.f32.partialorder %v3421_v34, 0.0  ;;  %v3486_v45 = vmul.f32 0.2, %v3422_v24  ;;  %v3514_v21 = vsel %vm3450_vm5, %v3418_v17, %v3482_v10  ;;  %v3427_v22 = vmul.f32 %v5683_v40, %v5632_v35  ;;  %3545 = vst [vmem:[%s5693_s8 + $0x50] sm:$0xff] %v3513_v16 }
 0x372   : > { %vm3454_vm9 = vcmp.ge.f32.partialorder %v3422_v24, 0.0  ;;  %v3487_v26 = vmul.f32 0.2, %v3423_v7  ;;  %v3515_v1 = vsel %vm3451_vm6, %v3419_v59, %v3483_v61  ;;  %v3428_v2 = vmul.f32 %v5683_v40, %v5638_v44  ;;  %3546 = vst [vmem:[%s5693_s8 + $0x58] sm:$0xff] %v3514_v21 }
 0x373   : > { %vm3455_vm10 = vcmp.ge.f32.partialorder %v3423_v7, 0.0  ;;  %v3488_v47 = vmul.f32 0.2, %v3424_v36  ;;  %v3516_v41 = vsel %vm3452_vm7, %v3420_v11, %v3484_v29  ;;  %v3429_v54 = vmul.f32 %v5683_v40, %v5644_v57  ;;  %3547 = vst [vmem:[%s5693_s8 + $0x60] sm:$0xff] %v3515_v1 }
 0x374   : > { %vm3456_vm11 = vcmp.ge.f32.partialorder %v3424_v36, 0.0  ;;  %v3489_v35 = vmul.f32 0.2, %v3425_v15  ;;  %v3517_v53 = vsel %vm3453_vm8, %v3421_v34, %v3485_v52  ;;  %v3430_v14 = vmul.f32 %v5683_v40, %v5650_v56  ;;  %3548 = vst [vmem:[%s5693_s8 + $0x68] sm:$0xff] %v3516_v41 }
 0x375   : > { %vm3457_vm12 = vcmp.ge.f32.partialorder %v3425_v15, 0.0  ;;  %v3490_v44 = vmul.f32 0.2, %v3426_v12  ;;  %v3518_v3 = vsel %vm3454_vm9, %v3422_v24, %v3486_v45  ;;  %v3431_v63 = vmul.f32 %v5683_v40, %v5656_v33  ;;  %3549 = vst [vmem:[%s5693_s8 + $0x70] sm:$0xff] %v3517_v53 }
 0x376   : > { %vm3458_vm13 = vcmp.ge.f32.partialorder %v3426_v12, 0.0  ;;  %v3491_v57 = vmul.f32 0.2, %v3427_v22  ;;  %v3519_v51 = vsel %vm3455_vm10, %v3423_v7, %v3487_v26  ;;  %v3432_v25 = vmul.f32 %v5683_v40, %v5662_v4  ;;  %3550 = vst [vmem:[%s5693_s8 + $0x78] sm:$0xff] %v3518_v3 }
 0x377   : > { %vm3459_vm14 = vcmp.ge.f32.partialorder %v3427_v22, 0.0  ;;  %v3492_v56 = vmul.f32 0.2, %v3428_v2  ;;  %v3520_v13 = vsel %vm3456_vm11, %v3424_v36, %v3488_v47  ;;  %v3433_v37 = vmul.f32 %v5683_v40, %v5497_v8  ;;  %3551 = vst [vmem:[%s5693_s8 + $0x80] sm:$0xff] %v3519_v51 }
 0x378   : > { %vm3460_vm15 = vcmp.ge.f32.partialorder %v3428_v2, 0.0  ;;  %v3493_v33 = vmul.f32 0.2, %v3429_v54  ;;  %v3521_v19 = vsel %vm3457_vm12, %v3425_v15, %v3489_v35  ;;  %v3434_v31 = vmul.f32 %v5683_v40, %v5500_v42  ;;  %3552 = vst [vmem:[%s5693_s8 + $0x88] sm:$0xff] %v3520_v13 }
 0x379   : > { %vm3461_vm0 = vcmp.ge.f32.partialorder %v3429_v54, 0.0  ;;  %v3494_v4 = vmul.f32 0.2, %v3430_v14  ;;  %v3522_v20 = vsel %vm3458_vm13, %v3426_v12, %v3490_v44  ;;  %v3435_v28 = vmul.f32 %v5683_v40, %v5503_v48  ;;  %3553 = vst [vmem:[%s5693_s8 + $0x90] sm:$0xff] %v3521_v19 }
 0x37a   : > { %vm3462_vm1 = vcmp.ge.f32.partialorder %v3430_v14, 0.0  ;;  %v3495_v8 = vmul.f32 0.2, %v3431_v63  ;;  %v3523_v18 = vsel %vm3459_vm14, %v3427_v22, %v3491_v57  ;;  %v3436_v6 = vmul.f32 %v5683_v40, %v5506_v49  ;;  %3554 = vst [vmem:[%s5693_s8 + $0x98] sm:$0xff] %v3522_v20 }
 0x37b   : > { %vm3463_vm2 = vcmp.ge.f32.partialorder %v3431_v63, 0.0  ;;  %v3496_v42 = vmul.f32 0.2, %v3432_v25  ;;  %v3524_v38 = vsel %vm3460_vm15, %v3428_v2, %v3492_v56  ;;  %v3437_v30 = vmul.f32 %v5683_v40, %v5509_v0  ;;  %3555 = vst [vmem:[%s5693_s8 + $0xa0] sm:$0xff] %v3523_v18 }
 0x37c   : > { %vm3464_vm3 = vcmp.ge.f32.partialorder %v3432_v25, 0.0  ;;  %v3497_v48 = vmul.f32 0.2, %v3433_v37  ;;  %v3525_v60 = vsel %vm3461_vm0, %v3429_v54, %v3493_v33  ;;  %v3438_v17 = vmul.f32 %v5683_v40, %v5512_v55  ;;  %3556 = vst [vmem:[%s5693_s8 + $0xa8] sm:$0xff] %v3524_v38 }
 0x37d   : > { %vm3465_vm4 = vcmp.ge.f32.partialorder %v3433_v37, 0.0  ;;  %v3498_v49 = vmul.f32 0.2, %v3434_v31  ;;  %v3526_v27 = vsel %vm3462_vm1, %v3430_v14, %v3494_v4  ;;  %vm3466_vm5 = vcmp.ge.f32.partialorder %v3434_v31, 0.0  ;;  %3557 = vst [vmem:[%s5693_s8 + $0xb0] sm:$0xff] %v3525_v60 }
 0x37e   : > { %v3499_v46 = vmul.f32 0.2, %v3435_v28  ;;  %v3527_v0 = vsel %vm3463_vm2, %v3431_v63, %v3495_v8  ;;  %vm3467_vm6 = vcmp.ge.f32.partialorder %v3435_v28, 0.0  ;;  %v3500_v59 = vmul.f32 0.2, %v3436_v6  ;;  %3558 = vst [vmem:[%s5693_s8 + $0xb8] sm:$0xff] %v3526_v27 }
 0x37f   : > { %v3528_v23 = vsel %vm3464_vm3, %v3432_v25, %v3496_v42  ;;  %vm3468_vm7 = vcmp.ge.f32.partialorder %v3436_v6, 0.0  ;;  %v3501_v55 = vmul.f32 0.2, %v3437_v30  ;;  %v3529_v40 = vsel %vm3465_vm4, %v3433_v37, %v3497_v48  ;;  %3559 = vst [vmem:[%s5693_s8 + $0xc0] sm:$0xff] %v3527_v0 }
 0x380   : > { %vm3469_vm8 = vcmp.ge.f32.partialorder %v3437_v30, 0.0  ;;  %v3502_v39 = vmul.f32 0.2, %v3438_v17  ;;  %v3530_v11 = vsel %vm3466_vm5, %v3434_v31, %v3498_v49  ;;  %vm3470_vm9 = vcmp.ge.f32.partialorder %v3438_v17, 0.0  ;;  %3560 = vst [vmem:[%s5693_s8 + $0xc8] sm:$0xff] %v3528_v23 }
 0x381   : > { %v3531_v9 = vsel %vm3467_vm6, %v3435_v28, %v3499_v46  ;;  %v3532_v50 = vsel %vm3468_vm7, %v3436_v6, %v3500_v59  ;;  %3561 = vst [vmem:[%s5693_s8 + $0xd0] sm:$0xff] %v3529_v40  ;;  %v3533_v34 = vsel %vm3469_vm8, %v3437_v30, %v3501_v55 }
 0x382   : > { %3562 = vst [vmem:[%s5693_s8 + $0xd8] sm:$0xff] %v3530_v11  ;;  %v3534_v32 = vsel %vm3470_vm9, %v3438_v17, %v3502_v39 }
 0x383   : > { %3563 = vst [vmem:[%s5693_s8 + $0xe0] sm:$0xff] %v3531_v9 }
 0x384   : > { %3564 = vst [vmem:[%s5693_s8 + $0xe8] sm:$0xff] %v3532_v50 }
 0x385   : > { %3565 = vst [vmem:[%s5693_s8 + $0xf0] sm:$0xff] %v3533_v34 }
 0x386   : > { %3566 = vst [vmem:[%s5693_s8 + $0xf8] sm:$0xff] %v3534_v32 }
 0x387 PF: > { %s12_s9 = sadd.s32 1, %s4287_s9  }
 0x388   : > { %p9_p4 = scmp.ge.s32.totalorder %s12_s9, 4  }
 0x38a   :  { %11 = sbr.rel (!%p9_p4) target bundleno = 1 (0x1), region = 66 }

</bundles_post_ra>
